<compile_context>
chip_gen: v5e
topology: v5e:2x2
jax: 0.10.0
libtpu: 0.0.40
codegen_flags: <defaults>
</compile_context>

<pallas_src>
import functools
import math
from dataclasses import dataclass

import numpy as np
import jax
import jax.numpy as jnp
from jax import lax
from jax.experimental import pallas as pl
from jax.experimental.pallas import tpu as pltpu


# ----------------------------------------------------------------------------- config
@dataclass
class ModelArgs:
    dim: int = 64
    n_layers: int = 4
    n_heads: int = 8
    multiple_of: int = 64
    norm_eps: float = 1e-5
    rope_theta: float = 100.0
    max_batch_size: int = 32
    max_seq_len: int = 258


# ----------------------------------------------------------------------------- fused transformer block kernel
@functools.lru_cache(maxsize=None)
def _make_block_kernel(n_heads: int, eps: float, apply_final: bool):
    NEG_BIG = -1e30  # finite stand-in for -inf (avoids NaN corner cases)

    def kernel(x_ref, an_ref, wqkv_ref, wo_ref, fn_ref, w13_ref, w2_ref,
               cos_ref, sin_ref, *rest):
        if apply_final:
            gn_ref, o_ref = rest
        else:
            (o_ref,) = rest

        Bt, S, D = x_ref.shape
        H = n_heads
        hd = D // H
        hd2 = hd // 2
        D2 = D // 2
        hidden = w13_ref.shape[1] // 2

        x = x_ref[...]                                   # (Bt, S, D) f32 residual stream
        x2 = x.reshape(Bt * S, D)

        # ---------------- attention RMSNorm (f32) -> bf16 MXU operands
        h = x2 * lax.rsqrt(jnp.mean(x2 * x2, axis=-1, keepdims=True) + eps)
        h = (h * an_ref[...]).astype(jnp.bfloat16)       # (Bt*S, D)

        # ---------------- fused QKV projection: one wide matmul (N = 3D)
        qkv = jnp.dot(h, wqkv_ref[...], preferred_element_type=jnp.float32)  # (Bt*S, 3D)
        qkv = qkv.reshape(Bt, S, 3 * D)
        q = qkv[..., :D]          # re|im permuted layout, 1/sqrt(hd) pre-folded
        k = qkv[..., D:2 * D]     # re|im permuted layout
        v = qkv[..., 2 * D:]      # original per-head layout

        # ---------------- RoPE on the flat layout: single 32-lane re|im split
        cos = cos_ref[...][None]                         # (1, S, D/2)
        sin = sin_ref[...][None]
        q_re, q_im = q[..., :D2], q[..., D2:]
        k_re, k_im = k[..., :D2], k[..., D2:]
        q_re_r = q_re * cos - q_im * sin
        q_im_r = q_re * sin + q_im * cos
        k_re_r = k_re * cos - k_im * sin
        k_im_r = k_re * sin + k_im * cos

        # ---------------- to head-major (Bt*H, S, hd) for the batched attention dots
        def to_heads(re, im):
            t = jnp.concatenate([re.reshape(Bt, S, H, hd2),
                                 im.reshape(Bt, S, H, hd2)], axis=-1)   # (Bt,S,H,hd)
            return t.transpose(0, 2, 1, 3).reshape(Bt * H, S, hd)

        qh = to_heads(q_re_r, q_im_r).astype(jnp.bfloat16)
        kh = to_heads(k_re_r, k_im_r).astype(jnp.bfloat16)
        vh = (v.reshape(Bt, S, H, hd).transpose(0, 2, 1, 3)
               .reshape(Bt * H, S, hd).astype(jnp.bfloat16))

        # ---------------- scores + in-kernel causal mask (scale folded into wq)
        s = jnp.einsum('gsd,gtd->gst', qh, kh,
                       preferred_element_type=jnp.float32)              # (Bt*H, S, S)
        row = lax.broadcasted_iota(jnp.int32, (S, S), 0)
        col = lax.broadcasted_iota(jnp.int32, (S, S), 1)
        s = s + jnp.where(col <= row, 0.0, NEG_BIG)

        # ---------------- softmax with deferred normalization
        s = s - jnp.max(s, axis=-1, keepdims=True)
        p = jnp.exp(s)
        denom = jnp.sum(p, axis=-1, keepdims=True)                      # (Bt*H, S, 1)

        o = jnp.einsum('gst,gtd->gsd', p.astype(jnp.bfloat16), vh,
                       preferred_element_type=jnp.float32)              # (Bt*H, S, hd)
        o = o * pl.reciprocal(denom)        # exact; tiny tensor, cheap either way
        o = o.reshape(Bt, H, S, hd).transpose(0, 2, 1, 3).reshape(Bt * S, D)

        # ---------------- flat output projection + residual
        attn = jnp.dot(o.astype(jnp.bfloat16), wo_ref[...],
                       preferred_element_type=jnp.float32)              # (Bt*S, D)
        hres = x2 + attn

        # ---------------- FFN: SwiGLU with fused w1||w3
        g = hres * lax.rsqrt(jnp.mean(hres * hres, axis=-1, keepdims=True) + eps)
        g = (g * fn_ref[...]).astype(jnp.bfloat16)
        a13 = jnp.dot(g, w13_ref[...], preferred_element_type=jnp.float32)  # (Bt*S, 2*hidden)
        a1 = a13[:, :hidden]
        a3 = a13[:, hidden:]
        silu = a1 * pl.reciprocal(1.0 + jnp.exp(-a1))    # exact sigmoid * a1
        ff = jnp.dot((silu * a3).astype(jnp.bfloat16), w2_ref[...],
                     preferred_element_type=jnp.float32)
        out = hres + ff

        # ---------------- fused final RMSNorm (last layer only)
        if apply_final:
            out = out * lax.rsqrt(jnp.mean(out * out, axis=-1, keepdims=True) + eps)
            out = out * gn_ref[...]

        o_ref[...] = out.reshape(Bt, S, D)

    return kernel


# ----------------------------------------------------------------------------- wrapper helpers
def _const_map(nd):
    return lambda b: (0,) * nd


def _choose_bt(B, S, H):
    # keep the per-step (Bt*H,S,S) f32 scores + bf16 probs under ~8 MiB,
    # and leave >= 2 parallel grid steps when the batch allows (dual-TC v7x).
    score_bytes = max(H * S * S * 6, 1)
    cap = max(1, (8 * 1024 * 1024) // score_bytes)
    bt = max(1, min(B, cap))
    while bt > 1 and (B % bt != 0 or B // bt < 2):
        bt -= 1
    return bt


def _vmem_limit(Bt, S, D, H, hidden, weight_bytes):
    try:
        phys = int(pltpu.get_tpu_info().vmem_capacity_bytes)
    except Exception:
        phys = 64 * 1024 * 1024  # conservative (v7x)
    score = Bt * H * S * S * 4
    act = Bt * S * max(3 * D, 2 * hidden) * 4
    io = 4 * Bt * S * D * 4
    est = 4 * score + 12 * act + 2 * io + 2 * weight_bytes + (4 << 20)
    return int(max(8 << 20, min(est, int(phys * 0.7))))


def transformer_block(x, lp, cos, sin, args, final_norm=None):
    B, S, D = x.shape
    H = args.n_heads
    hidden = lp['w2'].shape[0]
    Bt = _choose_bt(B, S, H)
    apply_final = final_norm is not None
    kernel = _make_block_kernel(H, float(args.norm_eps), apply_final)

    operands = [x, lp['attn_norm'], lp['wqkv'], lp['wo'],
                lp['ffn_norm'], lp['w13'], lp['w2'], cos, sin]
    if apply_final:
        operands.append(final_norm)

    in_specs = [pl.BlockSpec((Bt, S, D), lambda b: (b, 0, 0))]
    for arr in operands[1:]:
        in_specs.append(pl.BlockSpec(arr.shape, _const_map(arr.ndim)))

    weight_bytes = sum(int(np.prod(a.shape)) * a.dtype.itemsize for a in operands[1:])
    vmem = _vmem_limit(Bt, S, D, H, hidden, weight_bytes)

    return pl.pallas_call(
        kernel,
        out_shape=jax.ShapeDtypeStruct((B, S, D), jnp.float32),
        grid=(B // Bt,),
        in_specs=in_specs,
        out_specs=pl.BlockSpec((Bt, S, D), lambda b: (b, 0, 0)),
        compiler_params=pltpu.CompilerParams(
            dimension_semantics=("parallel",),     # >=2 steps feed both v7x TCs
            vmem_limit_bytes=vmem,
        ),
    )(*operands)


# ----------------------------------------------------------------------------- RoPE tables
def precompute_rope(head_dim, seqlen, theta, start_pos=0):
    hd2 = head_dim // 2
    freqs = 1.0 / (theta ** (jnp.arange(0, head_dim, 2, dtype=jnp.float32)[:hd2] / head_dim))
    t = jnp.arange(start_pos, start_pos + seqlen, dtype=jnp.float32)
    ang = jnp.outer(t, freqs)
    return jnp.cos(ang), jnp.sin(ang)                     # (S, hd2) each


# ----------------------------------------------------------------------------- forward
def transformer_forward(x, params, args, start_pos=0):
    # TODO(synk): start_pos > 0 with a KV cache is not implemented (the reference
    # Attention keeps no cache either); start_pos only offsets the RoPE positions.
    B, S, D = x.shape
    H = args.n_heads
    hd = D // H
    cos, sin = precompute_rope(hd, S, args.rope_theta, start_pos)
    cos = jnp.tile(cos, (1, H))                           # (S, D/2), head-major lanes
    sin = jnp.tile(sin, (1, H))

    h = x.astype(jnp.float32)
    n = len(params['layers'])
    for i, lp in enumerate(params['layers']):
        h = transformer_block(h, lp, cos, sin, args,
                              final_norm=params['norm'] if i == n - 1 else None)
    if n == 0:  # degenerate case: no layers -> plain final norm
        h = h * lax.rsqrt(jnp.mean(h * h, axis=-1, keepdims=True) + args.norm_eps)
        h = h * params['norm']
    return h


# ----------------------------------------------------------------------------- deterministic parameter init
def _linear_init(key, out_f, in_f):
    bound = 1.0 / math.sqrt(in_f)
    return jax.random.uniform(key, (out_f, in_f), jnp.float32, minval=-bound, maxval=bound)


def init_params(key, args):
    D = args.dim
    H = args.n_heads
    hd = D // H
    hd2 = hd // 2
    hidden = int(2 * (4 * D) / 3)
    hidden = args.multiple_of * ((hidden + args.multiple_of - 1) // args.multiple_of)
    scale = 1.0 / math.sqrt(hd)

    # column permutation for q/k: all real lanes first (head-major, freq-minor),
    # then all imaginary lanes -> RoPE becomes a single 32-lane split in-kernel.
    perm_re = np.array([h * hd + 2 * j for h in range(H) for j in range(hd2)])
    perm_im = perm_re + 1
    perm = np.concatenate([perm_re, perm_im])

    keys = iter(jax.random.split(key, 7 * args.n_layers + 2))
    layers = []
    for _ in range(args.n_layers):
        wq = _linear_init(next(keys), D, D)
        wk = _linear_init(next(keys), D, D)
        wv = _linear_init(next(keys), D, D)
        wo = _linear_init(next(keys), D, D)
        w1 = _linear_init(next(keys), hidden, D)
        w2 = _linear_init(next(keys), D, hidden)
        w3 = _linear_init(next(keys), hidden, D)

        # fused, MXU-friendly weight layouts (built once, host side)
        wq_p = (wq.T * scale)[:, perm]                    # attention scale folded in
        wk_p = wk.T[:, perm]
        wqkv = jnp.concatenate([wq_p, wk_p, wv.T], axis=1).astype(jnp.bfloat16)  # (D, 3D)
        w13 = jnp.concatenate([w1.T, w3.T], axis=1).astype(jnp.bfloat16)         # (D, 2*hidden)

        layers.append(dict(
            wqkv=wqkv,
            wo=wo.T.astype(jnp.bfloat16),                 # (D, D)
            w13=w13,
            w2=w2.T.astype(jnp.bfloat16),                 # (hidden, D)
            attn_norm=jnp.ones((1, D), jnp.float32),
            ffn_norm=jnp.ones((1, D), jnp.float32),
        ))
    return dict(layers=layers, norm=jnp.ones((1, D), jnp.float32))


# ----------------------------------------------------------------------------- main
if __name__ == "__main__":
    args = ModelArgs(dim=64, n_layers=4, n_heads=8, multiple_of=64,
                     norm_eps=1e-5, rope_theta=100.0)
    B, S = 2, 8

    key = jax.random.PRNGKey(0)
    kx, kp = jax.random.split(key)
    x = jax.random.normal(kx, (B, S, args.dim), jnp.float32)
    params = init_params(kp, args)

    out = transformer_forward(x, params, args, start_pos=0)
    out = jax.block_until_ready(out)
    assert out.shape == (B, S, args.dim), out.shape
    assert bool(jnp.all(jnp.isfinite(out)))
    print("KERNEL_OK")
</pallas_src>

<mosaic_0001>
module attributes {stable_mosaic.version = 11 : i64} {
  func.func @kernel(%arg0: i32, %arg1: memref<1x8x64xf32, #tpu.memory_space<vmem>>, %arg2: memref<1x64xf32, #tpu.memory_space<vmem>>, %arg3: memref<64x192xbf16, #tpu.memory_space<vmem>>, %arg4: memref<64x64xbf16, #tpu.memory_space<vmem>>, %arg5: memref<1x64xf32, #tpu.memory_space<vmem>>, %arg6: memref<64x384xbf16, #tpu.memory_space<vmem>>, %arg7: memref<192x64xbf16, #tpu.memory_space<vmem>>, %arg8: memref<8x32xf32, #tpu.memory_space<vmem>>, %arg9: memref<8x32xf32, #tpu.memory_space<vmem>>, %arg10: memref<1x8x64xf32, #tpu.memory_space<vmem>>) attributes {dimension_semantics = [#tpu.dimension_semantics<parallel>], iteration_bounds = array<i64: 2>, scalar_prefetch = 0 : i64, scratch_operands = 0 : i64, tpu.core_type = #tpu.core_type<tc>, window_params = [{transform_indices = @transform_0, window_bounds = array<i64: 1, 8, 64>}, {pipeline_mode = #tpu.pipeline_mode<synchronous>, transform_indices = @transform_1, window_bounds = array<i64: 1, 64>}, {pipeline_mode = #tpu.pipeline_mode<synchronous>, transform_indices = @transform_2, window_bounds = array<i64: 64, 192>}, {pipeline_mode = #tpu.pipeline_mode<synchronous>, transform_indices = @transform_3, window_bounds = array<i64: 64, 64>}, {pipeline_mode = #tpu.pipeline_mode<synchronous>, transform_indices = @transform_4, window_bounds = array<i64: 1, 64>}, {pipeline_mode = #tpu.pipeline_mode<synchronous>, transform_indices = @transform_5, window_bounds = array<i64: 64, 384>}, {pipeline_mode = #tpu.pipeline_mode<synchronous>, transform_indices = @transform_6, window_bounds = array<i64: 192, 64>}, {pipeline_mode = #tpu.pipeline_mode<synchronous>, transform_indices = @transform_7, window_bounds = array<i64: 8, 32>}, {pipeline_mode = #tpu.pipeline_mode<synchronous>, transform_indices = @transform_8, window_bounds = array<i64: 8, 32>}, {transform_indices = @transform_9, window_bounds = array<i64: 1, 8, 64>}]} {
    %c0 = arith.constant 0 : index
    %c0_0 = arith.constant 0 : index
    %c0_1 = arith.constant 0 : index
    %0 = vector.load %arg1[%c0, %c0_0, %c0_1] : memref<1x8x64xf32, #tpu.memory_space<vmem>>, vector<1x8x64xf32>
    %1 = vector.shape_cast %0 : vector<1x8x64xf32> to vector<8x64xf32>
    %2 = arith.mulf %1, %1 : vector<8x64xf32>
    %cst = arith.constant dense<0.000000e+00> : vector<8xf32>
    %3 = vector.multi_reduction <add>, %2, %cst [1] : vector<8x64xf32> to vector<8xf32>
    %4 = vector.shape_cast %3 : vector<8xf32> to vector<8x1xf32>
    %cst_2 = arith.constant 6.400000e+01 : f32
    %5 = vector.broadcast %cst_2 : f32 to vector<8x1xf32>
    %6 = arith.divf %4, %5 : vector<8x1xf32>
    %cst_3 = arith.constant 9.99999974E-6 : f32
    %7 = vector.broadcast %cst_3 : f32 to vector<8x1xf32>
    %8 = arith.addf %6, %7 : vector<8x1xf32>
    %9 = math.rsqrt %8 : vector<8x1xf32>
    %10 = vector.broadcast %9 : vector<8x1xf32> to vector<8x64xf32>
    %11 = arith.mulf %1, %10 : vector<8x64xf32>
    %c0_4 = arith.constant 0 : index
    %c0_5 = arith.constant 0 : index
    %12 = vector.load %arg2[%c0_4, %c0_5] : memref<1x64xf32, #tpu.memory_space<vmem>>, vector<1x64xf32>
    %13 = vector.broadcast %12 : vector<1x64xf32> to vector<8x64xf32>
    %14 = arith.mulf %11, %13 : vector<8x64xf32>
    %15 = arith.truncf %14 : vector<8x64xf32> to vector<8x64xbf16>
    %c0_6 = arith.constant 0 : index
    %c0_7 = arith.constant 0 : index
    %16 = vector.load %arg3[%c0_6, %c0_7] : memref<64x192xbf16, #tpu.memory_space<vmem>>, vector<64x192xbf16>
    %cst_8 = arith.constant dense<0.000000e+00> : vector<8x192xf32>
    %17 = tpu.matmul %15, %16, %cst_8 {dimension_numbers = #tpu.dot_dimension_numbers<[1], [0], [0], [1], [0, 0, 1, 1], [], []>} : vector<8x64xbf16>, vector<64x192xbf16>, vector<8x192xf32> -> vector<8x192xf32>
    %18 = vector.shape_cast %17 : vector<8x192xf32> to vector<1x8x192xf32>
    %19 = vector.extract_strided_slice %18 {offsets = [0, 0, 0], sizes = [1, 8, 64], strides = [1, 1, 1]} : vector<1x8x192xf32> to vector<1x8x64xf32>
    %20 = vector.extract_strided_slice %18 {offsets = [0, 0, 64], sizes = [1, 8, 64], strides = [1, 1, 1]} : vector<1x8x192xf32> to vector<1x8x64xf32>
    %21 = vector.extract_strided_slice %18 {offsets = [0, 0, 128], sizes = [1, 8, 64], strides = [1, 1, 1]} : vector<1x8x192xf32> to vector<1x8x64xf32>
    %c0_9 = arith.constant 0 : index
    %c0_10 = arith.constant 0 : index
    %22 = vector.load %arg8[%c0_9, %c0_10] : memref<8x32xf32, #tpu.memory_space<vmem>>, vector<8x32xf32>
    %23 = vector.shape_cast %22 : vector<8x32xf32> to vector<1x8x32xf32>
    %c0_11 = arith.constant 0 : index
    %c0_12 = arith.constant 0 : index
    %24 = vector.load %arg9[%c0_11, %c0_12] : memref<8x32xf32, #tpu.memory_space<vmem>>, vector<8x32xf32>
    %25 = vector.shape_cast %24 : vector<8x32xf32> to vector<1x8x32xf32>
    %26 = vector.extract_strided_slice %19 {offsets = [0, 0, 0], sizes = [1, 8, 32], strides = [1, 1, 1]} : vector<1x8x64xf32> to vector<1x8x32xf32>
    %27 = vector.extract_strided_slice %19 {offsets = [0, 0, 32], sizes = [1, 8, 32], strides = [1, 1, 1]} : vector<1x8x64xf32> to vector<1x8x32xf32>
    %28 = vector.extract_strided_slice %20 {offsets = [0, 0, 0], sizes = [1, 8, 32], strides = [1, 1, 1]} : vector<1x8x64xf32> to vector<1x8x32xf32>
    %29 = vector.extract_strided_slice %20 {offsets = [0, 0, 32], sizes = [1, 8, 32], strides = [1, 1, 1]} : vector<1x8x64xf32> to vector<1x8x32xf32>
    %30 = arith.mulf %26, %23 : vector<1x8x32xf32>
    %31 = arith.mulf %27, %25 : vector<1x8x32xf32>
    %32 = arith.subf %30, %31 : vector<1x8x32xf32>
    %33 = arith.mulf %26, %25 : vector<1x8x32xf32>
    %34 = arith.mulf %27, %23 : vector<1x8x32xf32>
    %35 = arith.addf %33, %34 : vector<1x8x32xf32>
    %36 = arith.mulf %28, %23 : vector<1x8x32xf32>
    %37 = arith.mulf %29, %25 : vector<1x8x32xf32>
    %38 = arith.subf %36, %37 : vector<1x8x32xf32>
    %39 = arith.mulf %28, %25 : vector<1x8x32xf32>
    %40 = arith.mulf %29, %23 : vector<1x8x32xf32>
    %41 = arith.addf %39, %40 : vector<1x8x32xf32>
    %42 = vector.shape_cast %32 : vector<1x8x32xf32> to vector<1x8x8x4xf32>
    %43 = vector.shape_cast %35 : vector<1x8x32xf32> to vector<1x8x8x4xf32>
    %44 = tpu.concatenate %42, %43 in 3 : vector<1x8x8x4xf32>, vector<1x8x8x4xf32> -> vector<1x8x8x8xf32>
    %45 = tpu.transpose %44, [0, 2, 1, 3] : vector<1x8x8x8xf32> -> vector<1x8x8x8xf32>
    %46 = vector.shape_cast %45 : vector<1x8x8x8xf32> to vector<8x8x8xf32>
    %47 = arith.truncf %46 : vector<8x8x8xf32> to vector<8x8x8xbf16>
    %48 = vector.shape_cast %38 : vector<1x8x32xf32> to vector<1x8x8x4xf32>
    %49 = vector.shape_cast %41 : vector<1x8x32xf32> to vector<1x8x8x4xf32>
    %50 = tpu.concatenate %48, %49 in 3 : vector<1x8x8x4xf32>, vector<1x8x8x4xf32> -> vector<1x8x8x8xf32>
    %51 = tpu.transpose %50, [0, 2, 1, 3] : vector<1x8x8x8xf32> -> vector<1x8x8x8xf32>
    %52 = vector.shape_cast %51 : vector<1x8x8x8xf32> to vector<8x8x8xf32>
    %53 = arith.truncf %52 : vector<8x8x8xf32> to vector<8x8x8xbf16>
    %54 = vector.shape_cast %21 : vector<1x8x64xf32> to vector<1x8x8x8xf32>
    %55 = tpu.transpose %54, [0, 2, 1, 3] : vector<1x8x8x8xf32> -> vector<1x8x8x8xf32>
    %56 = vector.shape_cast %55 : vector<1x8x8x8xf32> to vector<8x8x8xf32>
    %57 = arith.truncf %56 : vector<8x8x8xf32> to vector<8x8x8xbf16>
    "tpu.trace_start"() <{level = 10 : i32, message = "gsd,gtd->gst"}> : () -> ()
    %cst_13 = arith.constant dense<0.000000e+00> : vector<8x8x8xf32>
    %58 = tpu.matmul %47, %53, %cst_13 {dimension_numbers = #tpu.dot_dimension_numbers<[2], [2], [1], [1], [0, 0, 0, 1, 1, 1], [0], [0]>} : vector<8x8x8xbf16>, vector<8x8x8xbf16>, vector<8x8x8xf32> -> vector<8x8x8xf32>
    "tpu.trace_stop"() : () -> ()
    %59 = tpu.iota {dimensions = array<i32: 0>} : vector<8x8xi32>
    %60 = tpu.iota {dimensions = array<i32: 1>} : vector<8x8xi32>
    %61 = arith.cmpi sle, %60, %59 : vector<8x8xi32>
    %cst_14 = arith.constant 0.000000e+00 : f32
    %cst_15 = arith.constant -1.000000e+30 : f32
    %62 = vector.broadcast %cst_14 : f32 to vector<8x8xf32>
    %63 = vector.broadcast %cst_15 : f32 to vector<8x8xf32>
    %64 = arith.select %61, %62, %63 : vector<8x8xi1>, vector<8x8xf32>
    %65 = vector.shape_cast %64 : vector<8x8xf32> to vector<1x8x8xf32>
    %66 = vector.broadcast %65 : vector<1x8x8xf32> to vector<8x8x8xf32>
    %67 = arith.addf %58, %66 : vector<8x8x8xf32>
    %cst_16 = arith.constant dense<0xFF800000> : vector<8x8xf32>
    %68 = vector.multi_reduction <maximumf>, %67, %cst_16 [2] : vector<8x8x8xf32> to vector<8x8xf32>
    %69 = vector.shape_cast %68 : vector<8x8xf32> to vector<8x8x1xf32>
    %70 = vector.broadcast %69 : vector<8x8x1xf32> to vector<8x8x8xf32>
    %71 = arith.subf %67, %70 : vector<8x8x8xf32>
    %72 = math.exp %71 : vector<8x8x8xf32>
    %cst_17 = arith.constant dense<0.000000e+00> : vector<8x8xf32>
    %73 = vector.multi_reduction <add>, %72, %cst_17 [2] : vector<8x8x8xf32> to vector<8x8xf32>
    %74 = vector.shape_cast %73 : vector<8x8xf32> to vector<8x8x1xf32>
    %75 = arith.truncf %72 : vector<8x8x8xf32> to vector<8x8x8xbf16>
    "tpu.trace_start"() <{level = 10 : i32, message = "gst,gtd->gsd"}> : () -> ()
    %cst_18 = arith.constant dense<0.000000e+00> : vector<8x8x8xf32>
    %76 = tpu.matmul %75, %57, %cst_18 {dimension_numbers = #tpu.dot_dimension_numbers<[2], [1], [1], [2], [0, 0, 0, 1, 1, 2], [0], [0]>} : vector<8x8x8xbf16>, vector<8x8x8xbf16>, vector<8x8x8xf32> -> vector<8x8x8xf32>
    "tpu.trace_stop"() : () -> ()
    %77 = tpu.reciprocal %74 : vector<8x8x1xf32> -> vector<8x8x1xf32>
    %78 = vector.broadcast %77 : vector<8x8x1xf32> to vector<8x8x8xf32>
    %79 = arith.mulf %76, %78 : vector<8x8x8xf32>
    %80 = vector.shape_cast %79 : vector<8x8x8xf32> to vector<1x8x8x8xf32>
    %81 = tpu.transpose %80, [0, 2, 1, 3] : vector<1x8x8x8xf32> -> vector<1x8x8x8xf32>
    %82 = vector.shape_cast %81 : vector<1x8x8x8xf32> to vector<8x64xf32>
    %83 = arith.truncf %82 : vector<8x64xf32> to vector<8x64xbf16>
    %c0_19 = arith.constant 0 : index
    %c0_20 = arith.constant 0 : index
    %84 = vector.load %arg4[%c0_19, %c0_20] : memref<64x64xbf16, #tpu.memory_space<vmem>>, vector<64x64xbf16>
    %cst_21 = arith.constant dense<0.000000e+00> : vector<8x64xf32>
    %85 = tpu.matmul %83, %84, %cst_21 {dimension_numbers = #tpu.dot_dimension_numbers<[1], [0], [0], [1], [0, 0, 1, 1], [], []>} : vector<8x64xbf16>, vector<64x64xbf16>, vector<8x64xf32> -> vector<8x64xf32>
    %86 = arith.addf %1, %85 : vector<8x64xf32>
    %87 = arith.mulf %86, %86 : vector<8x64xf32>
    %cst_22 = arith.constant dense<0.000000e+00> : vector<8xf32>
    %88 = vector.multi_reduction <add>, %87, %cst_22 [1] : vector<8x64xf32> to vector<8xf32>
    %89 = vector.shape_cast %88 : vector<8xf32> to vector<8x1xf32>
    %cst_23 = arith.constant 6.400000e+01 : f32
    %90 = vector.broadcast %cst_23 : f32 to vector<8x1xf32>
    %91 = arith.divf %89, %90 : vector<8x1xf32>
    %cst_24 = arith.constant 9.99999974E-6 : f32
    %92 = vector.broadcast %cst_24 : f32 to vector<8x1xf32>
    %93 = arith.addf %91, %92 : vector<8x1xf32>
    %94 = math.rsqrt %93 : vector<8x1xf32>
    %95 = vector.broadcast %94 : vector<8x1xf32> to vector<8x64xf32>
    %96 = arith.mulf %86, %95 : vector<8x64xf32>
    %c0_25 = arith.constant 0 : index
    %c0_26 = arith.constant 0 : index
    %97 = vector.load %arg5[%c0_25, %c0_26] : memref<1x64xf32, #tpu.memory_space<vmem>>, vector<1x64xf32>
    %98 = vector.broadcast %97 : vector<1x64xf32> to vector<8x64xf32>
    %99 = arith.mulf %96, %98 : vector<8x64xf32>
    %100 = arith.truncf %99 : vector<8x64xf32> to vector<8x64xbf16>
    %c0_27 = arith.constant 0 : index
    %c0_28 = arith.constant 0 : index
    %101 = vector.load %arg6[%c0_27, %c0_28] : memref<64x384xbf16, #tpu.memory_space<vmem>>, vector<64x384xbf16>
    %cst_29 = arith.constant dense<0.000000e+00> : vector<8x384xf32>
    %102 = tpu.matmul %100, %101, %cst_29 {dimension_numbers = #tpu.dot_dimension_numbers<[1], [0], [0], [1], [0, 0, 1, 1], [], []>} : vector<8x64xbf16>, vector<64x384xbf16>, vector<8x384xf32> -> vector<8x384xf32>
    %103 = vector.extract_strided_slice %102 {offsets = [0, 0], sizes = [8, 192], strides = [1, 1]} : vector<8x384xf32> to vector<8x192xf32>
    %104 = vector.extract_strided_slice %102 {offsets = [0, 192], sizes = [8, 192], strides = [1, 1]} : vector<8x384xf32> to vector<8x192xf32>
    %cst_30 = arith.constant 0.000000e+00 : f32
    %105 = vector.broadcast %cst_30 : f32 to vector<8x192xf32>
    %106 = arith.subf %105, %103 : vector<8x192xf32>
    %107 = math.exp %106 : vector<8x192xf32>
    %cst_31 = arith.constant 1.000000e+00 : f32
    %108 = vector.broadcast %cst_31 : f32 to vector<8x192xf32>
    %109 = arith.addf %108, %107 : vector<8x192xf32>
    %110 = tpu.reciprocal %109 : vector<8x192xf32> -> vector<8x192xf32>
    %111 = arith.mulf %103, %110 : vector<8x192xf32>
    %112 = arith.mulf %111, %104 : vector<8x192xf32>
    %113 = arith.truncf %112 : vector<8x192xf32> to vector<8x192xbf16>
    %c0_32 = arith.constant 0 : index
    %c0_33 = arith.constant 0 : index
    %114 = vector.load %arg7[%c0_32, %c0_33] : memref<192x64xbf16, #tpu.memory_space<vmem>>, vector<192x64xbf16>
    %cst_34 = arith.constant dense<0.000000e+00> : vector<8x64xf32>
    %115 = tpu.matmul %113, %114, %cst_34 {dimension_numbers = #tpu.dot_dimension_numbers<[1], [0], [0], [1], [0, 0, 1, 1], [], []>} : vector<8x192xbf16>, vector<192x64xbf16>, vector<8x64xf32> -> vector<8x64xf32>
    %116 = arith.addf %86, %115 : vector<8x64xf32>
    %117 = vector.shape_cast %116 : vector<8x64xf32> to vector<1x8x64xf32>
    %c0_35 = arith.constant 0 : index
    %c0_36 = arith.constant 0 : index
    %c0_37 = arith.constant 0 : index
    %118 = vector.load %arg10[%c0_35, %c0_36, %c0_37] : memref<1x8x64xf32, #tpu.memory_space<vmem>>, vector<1x8x64xf32>
    tpu.vector_store %arg10[%c0_35, %c0_36, %c0_37], %117 {strides = array<i32>} : memref<1x8x64xf32, #tpu.memory_space<vmem>>, vector<1x8x64xf32>,
    return
  }
  func.func @transform_0(%arg0: i32) -> (i32, i32, i32) {
    %c0_i32 = arith.constant 0 : i32
    %c0_i32_0 = arith.constant 0 : i32
    %c0_i32_1 = arith.constant 0 : i32
    return %arg0, %c0_i32, %c0_i32_0 : i32, i32, i32
  }
  func.func @transform_1(%arg0: i32) -> (i32, i32) {
    %c0_i32 = arith.constant 0 : i32
    %c0_i32_0 = arith.constant 0 : i32
    %c0_i32_1 = arith.constant 0 : i32
    return %c0_i32, %c0_i32_0 : i32, i32
  }
  func.func @transform_2(%arg0: i32) -> (i32, i32) {
    %c0_i32 = arith.constant 0 : i32
    %c0_i32_0 = arith.constant 0 : i32
    %c0_i32_1 = arith.constant 0 : i32
    return %c0_i32, %c0_i32_0 : i32, i32
  }
  func.func @transform_3(%arg0: i32) -> (i32, i32) {
    %c0_i32 = arith.constant 0 : i32
    %c0_i32_0 = arith.constant 0 : i32
    %c0_i32_1 = arith.constant 0 : i32
    return %c0_i32, %c0_i32_0 : i32, i32
  }
  func.func @transform_4(%arg0: i32) -> (i32, i32) {
    %c0_i32 = arith.constant 0 : i32
    %c0_i32_0 = arith.constant 0 : i32
    %c0_i32_1 = arith.constant 0 : i32
    return %c0_i32, %c0_i32_0 : i32, i32
  }
  func.func @transform_5(%arg0: i32) -> (i32, i32) {
    %c0_i32 = arith.constant 0 : i32
    %c0_i32_0 = arith.constant 0 : i32
    %c0_i32_1 = arith.constant 0 : i32
    return %c0_i32, %c0_i32_0 : i32, i32
  }
  func.func @transform_6(%arg0: i32) -> (i32, i32) {
    %c0_i32 = arith.constant 0 : i32
    %c0_i32_0 = arith.constant 0 : i32
    %c0_i32_1 = arith.constant 0 : i32
    return %c0_i32, %c0_i32_0 : i32, i32
  }
  func.func @transform_7(%arg0: i32) -> (i32, i32) {
    %c0_i32 = arith.constant 0 : i32
    %c0_i32_0 = arith.constant 0 : i32
    %c0_i32_1 = arith.constant 0 : i32
    return %c0_i32, %c0_i32_0 : i32, i32
  }
  func.func @transform_8(%arg0: i32) -> (i32, i32) {
    %c0_i32 = arith.constant 0 : i32
    %c0_i32_0 = arith.constant 0 : i32
    %c0_i32_1 = arith.constant 0 : i32
    return %c0_i32, %c0_i32_0 : i32, i32
  }
  func.func @transform_9(%arg0: i32) -> (i32, i32, i32) {
    %c0_i32 = arith.constant 0 : i32
    %c0_i32_0 = arith.constant 0 : i32
    %c0_i32_1 = arith.constant 0 : i32
    return %arg0, %c0_i32, %c0_i32_0 : i32, i32, i32
  }
}

</mosaic_0001>

<bundles_post_ra>
// kernel: tpu_custom_call.1
= control target key start
LH: loop header
LB: loop body
LE: loop exit
PB: predicated region body
PF: predicated region fallthrough
CT: control target
= control target key end

     0   :  { %s5075_s0 = inlined_call_operand.hbm [shape: f32[2,8,64], index: 0, kind: input, shape index: {}]   ;;  %s5076_s1 = inlined_call_operand.vmem [shape: f32[1,64], index: 1, kind: input, shape index: {}]   ;;  %s5077_s2 = inlined_call_operand.vmem [shape: bf16[64,192], index: 2, kind: input, shape index: {}]   ;;  %s5078_s3 = inlined_call_operand.hbm [shape: bf16[64,64], index: 3, kind: input, shape index: {}]   ;;  %s5079_s4 = inlined_call_operand.vmem [shape: f32[1,64], index: 4, kind: input, shape index: {}]   ;;  %s5080_s5 = inlined_call_operand.vmem [shape: bf16[64,384], index: 5, kind: input, shape index: {}]   ;;  %s5081_s6 = inlined_call_operand.vmem [shape: bf16[192,64], index: 6, kind: input, shape index: {}]   ;;  %s5082_s7 = inlined_call_operand.hbm [shape: f32[8,32], index: 7, kind: input, shape index: {}]   ;;  %s5083_s8 = inlined_call_operand.hbm [shape: f32[8,32], index: 8, kind: input, shape index: {}]   ;;  %s5084_s9 = inlined_call_operand.hbm [shape: f32[2,8,64], index: 9, kind: output, shape index: {}]  }
   0x1   :  { %5085 = sst [smem:[#allocation15_spill]] %s5078_s3 }
   0x2   :  { %5086 = sst [smem:[#allocation16_spill]] %s5082_s7 }
   0x3   :  { %5087 = sst [smem:[#allocation17_spill]] %s5083_s8 }
   0x4   :  { %14 = vsyncpa [#allocation3], 0 }
   0x5   :  { %16 = vsyncpa [#allocation3 + $0x1], 0 }
   0x6   :  { %17 = vsyncpa [#allocation6], 0 }
   0x7   :  { %18 = vsyncpa [#allocation9], 0 }
   0x8   :  { %19 = vsyncpa [#allocation4], 0 }
   0x9   :  { %21 = vsyncpa [#allocation4 + $0x1], 0  ;;  %s3755_s30 = smov 0   ;;  %s3757_s10 = smov 0  }
   0xa   :  { %s3759_s11 = smov 0   ;;  %s3761_s12 = smov 0  }
   0xb LB: > { %s5088_s3 = sld [smem:[#allocation15_spill]]  ;;  %s3779_s16 = sadd.s32 4294967295, %s3674_s12   ;;  %s3674_s12 = sphi %s3761_s12, %s5111_s12   ;;  %s3670_s11 = sphi %s3759_s11, %s5110_s11   ;;  %s3666_s10 = sphi %s3757_s10, %s5109_s10   ;;  %s3662_s30 = sphi %s3755_s30, %s5108_s30  }
   0xc   : > { %p2968_p0 = scmp.ge.s32.totalorder %s3674_s12, 1  ;;  %p48_p1 = scmp.eq.s32.totalorder %s3779_s16, 0 }
   0xd   : > { %p252_p2 = scmp.lt.s32.totalorder %s3674_s12, 3  ;;  %s3676_s18 = smov [#allocation5]  }
   0xe   : > { %s271_s19 = sshll.u32 %s3676_s18, 4  ;;  %s5090_s7 = sld [smem:[#allocation16_spill]]  ;;  %s272_s19 = int_to_ptr.vmem [resolvable:$true] %s271_s19 }
   0xf   : > { %p3784_p3 = pnand %p2968_p0, %p252_p2  ;;  %s5092_s8 = sld [smem:[#allocation17_spill]] }
  0x10   : > { %s3677_s27 = smov [#allocation7]   ;;  %s3678_s29 = smov 64  }
  0x11   : > { %s269_s15 = sshll.u32 %s5088_s3, 4  ;;  %p3204_p4 = pneg %p3784_p3  ;;  %s270_s15 = int_to_ptr.hbm [resolvable:$true] %s269_s15 }
  0x12   : > { %s295_s28 = sshll.u32 %s3677_s27, 4  ;;  %s3679_s13 = smov 4   ;;  %s296_s28 = int_to_ptr.vmem [resolvable:$true] %s295_s28 }
  0x13   : > { %p3796_p6 = pnand %p3204_p4, %p48_p1  ;;  %s3680_s14 = smov [#allocation8]  }
  0x14   : > { %s293_s22 = sshll.u32 %s5090_s7, 4  ;;  %s307_s18 = sshll.u32 %s3680_s14, 4  ;;  %s294_s22 = int_to_ptr.hbm [resolvable:$true] %s293_s22  ;;  %s308_s18 = int_to_ptr.vmem [resolvable:$true] %s307_s18 }
  0x15   : > { %s305_s26 = sshll.u32 %s5092_s8, 4  ;;  %s2967_s20 = sadd.s32 4294967294, %s3674_s12   ;;  %s306_s26 = int_to_ptr.hbm [resolvable:$true] %s305_s26 }
  0x16   : > { %3207 = dma.hbm_to_vmem [thread:$0]  (!%p3796_p6), %s270_s15, 512, %s272_s19, [#allocation6], %s3678_s29, %s3678_s29, %s3679_s13  }
  0x17   : > { %3210 = dma.hbm_to_vmem [thread:$0]  (!%p3796_p6), %s294_s22, 128, %s296_s28, [#allocation6]  }
  0x18   : > { %3213 = dma.hbm_to_vmem [thread:$0]  (!%p3796_p6), %s306_s26, 128, %s308_s18, [#allocation9]  }
  0x19   : > { %s3811_s21 = sadd.s32 1, %s3674_s12   ;;  %s34_s24 = sadd.s32 1, %s3670_s11 }
  0x1a   : > { %s31_s15 = ssub.s32 %s3674_s12, %s3811_s21  ;;  %p41_p7 = scmp.ne.s32.totalorder %s3670_s11, %s3666_s10 }
  0x1b   : > { %p32_p8 = scmp.eq.s32.totalorder %s31_s15, 0  ;;  %p42_p9 = scmp.eq.s32.totalorder %s3674_s12, 0 }
  0x1c   : > { %p47_p10 = scmp.ne.s32.totalorder %s3666_s10, %s3662_s30  ;;  %p239_p11 = scmp.eq.s32.totalorder %s3779_s16, 1 }
  0x1d   : > { %s3823_s19 = scalar_select %p32_p8, %s3670_s11, %s34_s24  }
  0x1e   : > { %p3827_p12 = por %p48_p1, %p47_p10  ;;  %p3831_p13 = por %p239_p11, %p41_p7 }
  0x1f   : > { %p245_p0 = scmp.eq.s32.totalorder %s2967_s20, 1  ;;  %p43_p2 = por %p42_p9, %p41_p7 }
  0x20   : > { %s318_s25 = sand.u32 1, %s3670_s11   ;;  %p3225_p6 = scmp.lt.s32.totalorder %s3674_s12, 2 }
  0x21   : > { %p3836_p4 = por %p245_p0, %p47_p10  ;;  %s2973_s27 = sshll.u32 %s318_s25, 3 }
  0x22   : > { %s2974_s28 = sshll.u32 %s3674_s12, 3  ;;  %s322_s24 = scalar_lea.vmem [#allocation2], %s2973_s27 }
  0x23   : > { %s326_s14 = scalar_lea.hbm %s5075_s0, %s2974_s28  ;;  %s330_s15 = sshll.u32 %s322_s24, 4  ;;  %s331_s15 = int_to_ptr.vmem [resolvable:$true] %s330_s15 }
  0x24   : > { %s328_s18 = sshll.u32 %s326_s14, 4  ;;  %p3845_p8 = pnand %p3225_p6, %p43_p2  ;;  %s329_s18 = int_to_ptr.hbm [resolvable:$true] %s328_s18 }
  0x25   : > { %s319_s3 = scalar_lea.sflag [#allocation3], %s318_s25  ;;  %s3570_s7 = sshra.s32 %s329_s18, 4  ;;  %s3571_s7 = int_to_ptr.hbm [resolvable:$true] %s3570_s7 }
  0x26   : > { %s3572_s8 = scalar_lea.hbm %s3571_s7, 8  ;;  %p3574_p9 = pneg %p3845_p8 }
  0x27   : > { %p3573_p7 = scmp.ne.s32.totalorder %s3571_s7, %s3572_s8  ;;  %s3577_s27 = scalar_lea.hbm %s5075_s0, 16 }
  0x28   : > { %p3578_p0 = scmp.lt.s32.totalorder %s3571_s7, %s5075_s0  ;;  %p3579_p2 = scmp.lt.s32.totalorder %s3577_s27, %s3572_s8 }
  0x29   : > { %p3575_p10 = pnand %p3574_p9, %p3573_p7 }
  0x2a   : > { %p3580_p6 = por %p3579_p2, %p3578_p0 }
  0x2b   : > { %p3576_p11 = pneg %p3575_p10 }
  0x2d   : > { %p3581_p5 = pnand %p3580_p6, %p3576_p11 }
  0x2f   : > { %3584 = shalt.err (!%p3581_p5)
}
  0x30   : > { %3217 = dma.hbm_to_vmem [thread:$0]  (!%p3845_p8), %s329_s18, 128, %s331_s15, %s319_s3  }
  0x31   : > { %339 = sbr.rel (%p3784_p3) target bundleno = 2269 (0x8dd), region = 56  ;;  %s3862_s25 = sand.u32 (!%p3784_p3), 1, %s3666_s10  }
  0x32   : > { %s2976_s24 = sshll.u32 (!%p3784_p3), %s3862_s25, 3  ;;  %s342_s28 = scalar_lea.sflag (!%p3784_p3), [#allocation3], %s3862_s25 }
  0x33   : > { %s3868_s7 = scalar_lea.vmem (!%p3784_p3), [#allocation2], %s2976_s24 }
  0x36   : > { %3645 = dma.done.wait (%p3827_p12), %s342_s28, 128  }
  0x37   : > { %3647 = vsyncadd (%p3827_p12), %s342_s28, 4294967168 }
  0x38   : > { %3649 = dma.done.wait (%p48_p1), [#allocation6], 640  }
  0x39   : > { %3651 = vsyncadd (%p48_p1), [#allocation6], 4294966656 }
  0x3a   : > { %3653 = dma.done.wait (%p48_p1), [#allocation9], 128  }
  0x3b   : > { %3655 = vsyncadd (%p48_p1), [#allocation9], 4294967168  ;;  %v3883_v0 = vld [vmem:[%s3868_s7] sm:$0xff]  ;;  %vm399_vm0 = vcmask 523264   ;;  %v3681_v3 = vmov 64.0   ;;  %v3924_v24 = vld [vmem:[#allocation8] sm:$0xff] }
  0x3c   : > { %v398_v1 = vmul.f32 %v3883_v0, %v3883_v0  ;;  %3433 = vrcp.f32 %v3681_v3  ;;  %v3007_v5 = vld [vmem:[%s5077_s2 + $0x30] sm:$0xf]  ;;  %v3159_v6 = vld [vmem:[%s5077_s2 + $0x34] sm:$0xf0]  ;;  %v3158_v7 = vld [vmem:[%s5077_s2 + $0x34] sm:$0xf] }
  0x3d   : > { %v3008_v8 = vor.u32 %v3159_v6, %v3007_v5  ;;  %v3009_v9 = vld [vmem:[%s5077_s2 + $0x38] sm:$0xf0]  ;;  %v2999_v12 = vld [vmem:[%s5077_s2 + $0x20] sm:$0xf]  ;;  %v3157_v13 = vld [vmem:[%s5077_s2 + $0x24] sm:$0xf0] }
  0x3e   : > { %v400_v2 = vsel %vm399_vm0, %v398_v1, 0.0  ;;  %v3012_v10 = vor.u32 %v3158_v7, %v3009_v9  ;;  %v3156_v14 = vld [vmem:[%s5077_s2 + $0x24] sm:$0xf]  ;;  %v3000_v15 = vor.u32 %v3157_v13, %v2999_v12  ;;  %v3001_v16 = vld [vmem:[%s5077_s2 + $0x28] sm:$0xf0]  ;;  %s3682_s17 = smov 96  }
  0x3f   : > { %401 = vadd.xlane.f32.xlu0 %v400_v2  ;;  %484 = vmatpush.bf16.msra.mxu0 %v3008_v8  ;;  %v3004_v17 = vor.u32 %v3156_v14, %v3001_v16  ;;  %v2991_v19 = vld [vmem:[%s5077_s2 + $0x10] sm:$0xf]  ;;  %v3155_v20 = vld [vmem:[%s5077_s2 + $0x14] sm:$0xf0]  ;;  %v3154_v21 = vld [vmem:[%s5077_s2 + $0x14] sm:$0xf] }
  0x40   : > { %497 = vmatpush.bf16.msra.mxu1 %v3012_v10  ;;  %v2992_v22 = vor.u32 %v3155_v20, %v2991_v19  ;;  %v2993_v23 = vld [vmem:[%s5077_s2 + $0x18] sm:$0xf0]  ;;  %v2983_v25 = vld [vmem:[%s5077_s2] sm:$0xf]  ;;  %534 = vrot.lane.b32.xlu1 %v3924_v24, %s3682_s17  ;;  %v3153_v27 = vld [vmem:[%s5077_s2 + $0x4] sm:$0xf0] }
  0x41   : > { %v2996_v26 = vor.u32 %v3154_v21, %v2993_v23  ;;  %v3152_v28 = vld [vmem:[%s5077_s2 + $0x4] sm:$0xf]  ;;  %v2985_v29 = vld [vmem:[%s5077_s2 + $0x8] sm:$0xf0]  ;;  %v2984_v31 = vor.u32 %v3153_v27, %v2983_v25  ;;  %s3683_s13 = smov 64   ;;  %v3942_v34 = vld [vmem:[#allocation7] sm:$0xff] }
  0x42   : > { %v3434_v4 = vpop.eup %3433  ;;  %v2988_v32 = vor.u32 %v3152_v28, %v2985_v29  ;;  %v3431_v45 = vld [vmem:[%s5076_s1] ss:$0 sm:$0xff]  ;;  %s3684_s3 = smov 32   ;;  %s3685_s8 = smov 112   ;;  %vm579_vm5 = vcmask 1047556   ;;  %vm857_vm6 = vcmask 31744  }
  0x43   : > { %v404_v11 = vmul.f32 64.0, %v3434_v4  ;;  %485 = vmatpush.bf16.msra.mxu0 %v3000_v15  ;;  %vm408_vm1 = vweird.f32 %v3434_v4  ;;  %s3686_s22 = smov 120   ;;  %s3687_s18 = smov 124   ;;  %vm1708_vm7 = vcmask 64512   ;;  %vm1944_vm8 = vcmask 1043456  }
  0x44   : > { %498 = vmatpush.bf16.msra.mxu1 %v3004_v17  ;;  %s3688_s15 = smov 104   ;;  %s3689_s20 = smov 108  }
  0x45   : > { %v405_v18 = vsub.f32 1.0, %v404_v11  ;;  %s3690_s29 = smov 116   ;;  %s3691_s27 = smov 100  }
  0x46   : > { %s3694_s14 = smov 4   ;;  %s3695_s28 = smov 88  }
  0x47   : > { %v406_v30 = vmul.f32 %v3434_v4, %v405_v18  ;;  %486 = vmatpush.bf16.msra.mxu0 %v2992_v22 }
  0x48   : > { %499 = vmatpush.bf16.msra.mxu1 %v2996_v26  ;;  %543 = vrot.lane.b32.xlu1 %v3924_v24, %s3683_s13 }
  0x49   : > { %v407_v33 = vadd.f32 %v3434_v4, %v406_v30 }
  0x4b   : > { %487 = vmatpush.bf16.msra.mxu0 %v2984_v31  ;;  %v3944_v35 = vsel %vm408_vm1, %v3434_v4, %v407_v33 }
  0x4c   : > { %500 = vmatpush.bf16.msra.mxu1 %v2988_v32 }
  0x50   : > { %530 = vrot.lane.b32.xlu1 %v3942_v34, %s3683_s13 }
  0x53   : > { %547 = vrot.lane.b32.xlu0 %v3942_v34, %s3682_s17 }
  0xb2   : > { %v402_v36 = vpop.xlane.xlu0 %401  ;;  %v535_v56 = vpop.permute.xlu1 %534 }
  0xb3   : > { %v410_v37 = vmul.f32 %v3944_v35, %v402_v36 }
  0xb5   : > { %v411_v38 = vadd.f32 1e-05, %v410_v37 }
  0xb7   : > { %3435 = vrsqrt.f32 %v411_v38  ;;  %vm418_vm3 = vweird.f32 %v411_v38 }
  0xba   : > { %v544_v59 = vpop.permute.xlu1 %543 }
  0xbd   : > { %v3436_v39 = vpop.eup %3435 }
  0xbe   : > { %v413_v40 = vmul.f32 %v3436_v39, %v411_v38  ;;  %vm419_vm2 = vweird.f32 %v3436_v39 }
  0xbf   : > { %vm420_vm4 = vmor %vm418_vm3, %vm419_vm2 }
  0xc0   : > { %v414_v41 = vmul.f32 %v3436_v39, %v413_v40 }
  0xc2   : > { %v415_v42 = vmul.f32 0.5, %v414_v41  ;;  %v531_v61 = vpop.permute.xlu1 %530 }
  0xc4   : > { %v416_v43 = vsub.f32 1.5, %v415_v42 }
  0xc5   : > { %v548_v50 = vpop.permute.xlu0 %547 }
  0xc6   : > { %v417_v44 = vmul.f32 %v3436_v39, %v416_v43 }
  0xc8   : > { %v421_v46 = vsel %vm420_vm4, %v3436_v39, %v417_v44 }
  0xc9   : > { %v422_v47 = vmul.f32 %v421_v46, %v3883_v0 }
  0xcb   : > { %v427_v48 = vmul.f32 %v3431_v45, %v422_v47 }
  0xcd   : > { %v428_v49 = vpack.c.bf16 %v427_v48, %v427_v48 }
  0xcf   : > { %3013 = vmatmul.msk.bf16.vlgmr.msra.gmra.mxu0 %vm399_vm0, %v428_v49  ;;  %3014 = vmatmul.msk.bf16.vlgmr.msra.gmra.mxu1 %vm399_vm0, %v428_v49  ;;  %v3692_v49 = vmov 1983009808  }
 0x14c   : > { %v489_v51 = vpop.f32.mrf.mxu0  ;;  %v3957_v52 = vpop.f32.mrf.mxu1 }
 0x14d   : > { %v550_v53 = vmul.f32 %v548_v50, %v489_v51  ;;  %v537_v57 = vmul.f32 %v535_v56, %v489_v51  ;;  %v546_v62 = vmul.f32 %v544_v59, %v489_v51  ;;  %v533_v63 = vmul.f32 %v531_v61, %v489_v51 }
 0x14e   : > { %v519_v21 = vmul.f32 %v3924_v24, %v489_v51  ;;  %v508_v22 = vmul.f32 %v3942_v34, %v489_v51  ;;  %v584_v50 = vunpack.c.l.s4 %v3692_v49 }
 0x14f   : > { %552 = vrot.lane.b32.xlu2 %v550_v53, %s3682_s17 }
 0x154   : > { %v491_v54 = vpop.f32.mrf.mxu0  ;;  %v504_v55 = vpop.f32.mrf.mxu1 }
 0x157   : > { %521 = vrot.lane.b32.xlu2 %v3942_v34, %s3684_s3 }
 0x15f   : > { %539 = vrot.lane.b32.xlu2 %v537_v57, %s3682_s17 }
 0x1a9   : > { %v553_v58 = vpop.permute.xlu2 %552 }
 0x1aa   : > { %v555_v1 = vadd.f32 %v553_v58, %v546_v62 }
 0x1b1   : > { %v522_v60 = vpop.permute.xlu2 %521 }
 0x1b2   : > { %v524_v4 = vmul.f32 %v522_v60, %v489_v51 }
 0x1b9   : > { %v540_v0 = vpop.permute.xlu2 %539 }
 0x1ba   : > { %v3963_v2 = vsub.f32 %v533_v63, %v540_v0  ;;  %v4012_v63 = vunpack.c.0.s8 %v584_v50 }
 0x1bc   : > { %v3301_v3 = vpack.i.bf16 %v3963_v2, %v555_v1 }
 0x1be   : > { %3302 = vrot.lane.b32.xlu0 %v3301_v3, %s3685_s8  ;;  %3297 = vrot.lane.b32.xlu2 %v3301_v3, %s3686_s22 }
 0x1bf   : > { %3292 = vrot.lane.b32.xlu1 %v3301_v3, %s3687_s18 }
 0x1c6   : > { %3317 = vrot.lane.b32.xlu0 %v3301_v3, %s3688_s15  ;;  %3312 = vrot.lane.b32.xlu2 %v3301_v3, %s3689_s20 }
 0x1c7   : > { %3307 = vrot.lane.b32.xlu1 %v3301_v3, %s3690_s29 }
 0x1ce   : > { %526 = vrot.lane.b32.xlu0 %v524_v4, %s3682_s17  ;;  %3322 = vrot.lane.b32.xlu2 %v3301_v3, %s3691_s27 }
 0x1cf   : > { %510 = vrot.lane.b32.xlu1 %v3924_v24, %s3684_s3 }
 0x218   : > { %v3298_v5 = vpop.permute.xlu2 %3297 }
 0x219   : > { %v3300_v7 = vunpack.i.h.bf16 %v3298_v5  ;;  %v3299_v15 = vunpack.i.l.bf16 %v3298_v5 }
 0x220   : > { %v3313_v17 = vpop.permute.xlu2 %3312 }
 0x221   : > { %v3314_v30 = vunpack.i.l.bf16 %v3313_v17  ;;  %v3315_v38 = vunpack.i.h.bf16 %v3313_v17 }
 0x228   : > { %v3323_v19 = vpop.permute.xlu2 %3322 }
 0x229   : > { %v3324_v33 = vunpack.i.l.bf16 %v3323_v19  ;;  %v3325_v42 = vunpack.i.h.bf16 %v3323_v19 }
 0x230   : > { %v3303_v6 = vpop.permute.xlu0 %3302 }
 0x231   : > { %v3305_v8 = vunpack.i.h.bf16 %v3303_v6  ;;  %v3293_v9 = vpop.permute.xlu1 %3292  ;;  %v3304_v14 = vunpack.i.l.bf16 %v3303_v6 }
 0x232   : > { %v3294_v28 = vunpack.i.l.bf16 %v3293_v9  ;;  %v3295_v36 = vunpack.i.h.bf16 %v3293_v9 }
 0x233   : > { %v3376_v10 = vpack.i.bf16 %v3305_v8, %v3300_v7  ;;  %v3341_v16 = vpack.i.bf16 %v3304_v14, %v3299_v15 }
 0x234   : > { %v3336_v31 = vpack.i.bf16 %v3294_v28, %v555_v1  ;;  %v3371_v39 = vpack.i.bf16 %v3295_v36, %v3963_v2 }
 0x238   : > { %v3318_v18 = vpop.permute.xlu0 %3317 }
 0x239   : > { %v3308_v11 = vpop.permute.xlu1 %3307  ;;  %v3319_v24 = vunpack.i.l.bf16 %v3318_v18  ;;  %v3320_v41 = vunpack.i.h.bf16 %v3318_v18 }
 0x23a   : > { %v3309_v29 = vunpack.i.l.bf16 %v3308_v11  ;;  %v3310_v37 = vunpack.i.h.bf16 %v3308_v11 }
 0x23b   : > { %v3361_v34 = vpack.i.bf16 %v3324_v33, %v3319_v24  ;;  %v3386_v43 = vpack.i.bf16 %v3325_v42, %v3320_v41 }
 0x23c   : > { %v3351_v32 = vpack.i.bf16 %v3314_v30, %v3309_v29  ;;  %v3381_v40 = vpack.i.bf16 %v3315_v38, %v3310_v37 }
 0x240   : > { %v527_v20 = vpop.permute.xlu0 %526 }
 0x241   : > { %v511_v12 = vpop.permute.xlu1 %510  ;;  %v3980_v25 = vadd.f32 %v527_v20, %v519_v21  ;;  %v3693_v21 = vmov 1934713408  }
 0x242   : > { %v513_v13 = vmul.f32 %v511_v12, %v489_v51 }
 0x244   : > { %515 = vrot.lane.b32.xlu2 %v513_v13, %s3682_s17 }
 0x24c   : > { %3342 = vrot.lane.b32.xlu2 %v3341_v16, %s3683_s13 }
 0x29e   : > { %v516_v23 = vpop.permute.xlu2 %515 }
 0x29f   : > { %v518_v26 = vsub.f32 %v508_v22, %v516_v23  ;;  %v632_v22 = vunpack.c.l.s4 %v3693_v21 }
 0x2a1   : > { %v3346_v27 = vpack.i.bf16 %v518_v26, %v3980_v25  ;;  %v581_v56 = vrot.slane %v518_v26, 4 }
 0x2a3   : > { %3347 = vrot.lane.b32.xlu2 %v3346_v27, %s3685_s8  ;;  %3332 = vrot.lane.b32.xlu1 %v3346_v27, %s3686_s22 }
 0x2a4   : > { %3327 = vrot.lane.b32.xlu0 %v3346_v27, %s3687_s18  ;;  %s3696_s18 = smov 80  }
 0x2a6   : > { %v3343_v47 = vpop.permute.xlu2 %3342 }
 0x2a7   : > { %v3344_v55 = vunpack.i.l.bf16 %v3343_v47  ;;  %v3345_v62 = vunpack.i.h.bf16 %v3343_v47 }
 0x2a9   : > { %v1176_v1 = vrot.slane %v3344_v55, 4  ;;  %v1202_v16 = vrot.slane %v3345_v62, 4 }
 0x2ab   : > { %707 = vrot.lane.b32.xlu2 %v3980_v25, %s3688_s15  ;;  %3337 = vrot.lane.b32.xlu1 %v3336_v31, %s3683_s13 }
 0x2ac   : > { %3352 = vrot.lane.b32.xlu0 %v3351_v32, %s3683_s13 }
 0x2b3   : > { %572 = vrot.lane.b32.xlu2 %v518_v26, %s3688_s15  ;;  %3362 = vrot.lane.b32.xlu1 %v3361_v34, %s3683_s13 }
 0x2b4   : > { %3357 = vrot.lane.b32.xlu0 %v3346_v27, %s3690_s29  ;;  %s3703_s29 = smov 16  }
 0x2bb   : > { %3377 = vrot.lane.b32.xlu2 %v3376_v10, %s3683_s13  ;;  %3367 = vrot.lane.b32.xlu1 %v3346_v27, %s3689_s20  ;;  %s3697_s20 = smov 72  }
 0x2bc   : > { %710 = vrot.lane.b32.xlu0 %v3980_v25, %s3691_s27 }
 0x2c3   : > { %3372 = vrot.lane.b32.xlu1 %v3371_v39, %s3683_s13 }
 0x2c4   : > { %3382 = vrot.lane.b32.xlu0 %v3381_v40, %s3683_s13 }
 0x2cb   : > { %3387 = vrot.lane.b32.xlu1 %v3386_v43, %s3683_s13 }
 0x2d3   : > { %575 = vrot.lane.b32.xlu1 %v518_v26, %s3691_s27  ;;  %s3149_s27 = sshll.u32 %s3779_s16, 3 }
 0x2fd   : > { %v4017_v5 = vpop.permute.xlu2 %3347 }
 0x2fe   : > { %v3349_v43 = vunpack.i.l.bf16 %v4017_v5 }
 0x305   : > { %v708_v50 = vpop.permute.xlu2 %707 }
 0x315   : > { %v4002_v44 = vpop.permute.xlu1 %3332 }
 0x316   : > { %v4004_v45 = vpop.permute.xlu0 %3327  ;;  %v3335_v46 = vunpack.i.h.bf16 %v4002_v44 }
 0x317   : > { %v3330_v2 = vunpack.i.h.bf16 %v4004_v45 }
 0x318   : > { %v578_v51 = vrot.slane %v3335_v46, 4  ;;  %v582_v59 = vsel %vm579_vm5, %v3335_v46, %v581_v56  ;;  %v3334_v46 = vunpack.i.l.bf16 %v4002_v44 }
 0x319   : > { %v590_v6 = vperm.slane %v582_v59, %v4012_v63  ;;  %v593_v17 = vrot.slane %v3330_v2, 4  ;;  %v715_v59 = vrot.slane %v3980_v25, 4 }
 0x31a   : > { %v580_v0 = vsel %vm579_vm5, %v578_v51, %v518_v26 }
 0x31b   : > { %v4021_v7 = vperm.slane %v580_v0, %v4012_v63  ;;  %v641_v20 = vrot.slane %v590_v6, 4 }
 0x31d   : > { %v3338_v48 = vpop.permute.xlu1 %3337  ;;  %v629_v27 = vrot.slane %v4021_v7, 4 }
 0x31e   : > { %v4007_v53 = vpop.permute.xlu0 %3352  ;;  %v3340_v54 = vunpack.i.h.bf16 %v3338_v48  ;;  %v3339_v57 = vunpack.i.l.bf16 %v3338_v48 }
 0x31f   : > { %v3355_v60 = vunpack.i.h.bf16 %v4007_v53  ;;  %v3354_v61 = vunpack.i.l.bf16 %v4007_v53 }
 0x320   : > { %v1190_v58 = vrot.slane %v3340_v54, 4  ;;  %v1178_v4 = vrot.slane %v3339_v57, 4  ;;  %v1177_v9 = vsel %vm579_vm5, %v1176_v1, %v3339_v57 }
 0x321   : > { %v1214_v8 = vrot.slane %v3355_v60, 4  ;;  %v1188_v11 = vrot.slane %v3354_v61, 4  ;;  %v4032_v28 = vperm.slane %v1177_v9, %v4012_v63  ;;  %v739_v9 = vrot.slane %v3349_v43, 4 }
 0x322   : > { %v1191_v3 = vsel %vm579_vm5, %v3354_v61, %v1190_v58  ;;  %v1179_v18 = vsel %vm579_vm5, %v3344_v55, %v1178_v4  ;;  %v3329_v61 = vunpack.i.l.bf16 %v4004_v45  ;;  %v713_v45 = vrot.slane %v3334_v46, 4 }
 0x323   : > { %v1199_v12 = vperm.slane %v1191_v3, %v4012_v63  ;;  %v1189_v31 = vsel %vm579_vm5, %v1188_v11, %v3340_v54  ;;  %v1187_v24 = vperm.slane %v1179_v18, %v4012_v63  ;;  %v1226_v48 = vrot.slane %v4032_v28, 4 }
 0x324   : > { %v4051_v47 = vperm.slane %v1189_v31, %v4012_v63  ;;  %v716_v18 = vsel %vm579_vm5, %v3334_v46, %v715_v59 }
 0x325   : > { %v3363_v10 = vpop.permute.xlu1 %3362  ;;  %v1236_v32 = vrot.slane %v1199_v12, 4  ;;  %v1238_v51 = vrot.slane %v1187_v24, 4  ;;  %v4110_v46 = vperm.slane %v716_v18, %v4012_v63 }
 0x326   : > { %v4025_v13 = vpop.permute.xlu0 %3357  ;;  %v3365_v14 = vunpack.i.h.bf16 %v3363_v10  ;;  %v3364_v15 = vunpack.i.l.bf16 %v3363_v10  ;;  %v1227_v0 = vsel %vm579_vm5, %v4051_v47, %v1226_v48 }
 0x327   : > { %v3360_v19 = vunpack.i.h.bf16 %v4025_v13  ;;  %v1237_v55 = vsel %vm579_vm5, %v1236_v32, %v1187_v24  ;;  %v3359_v10 = vunpack.i.l.bf16 %v4025_v13  ;;  %v573_v24 = vpop.permute.xlu2 %572 }
 0x328   : > { %v1215_v23 = vsel %vm579_vm5, %v3365_v14, %v1214_v8  ;;  %v1200_v26 = vrot.slane %v3364_v15, 4  ;;  %v1212_v36 = vrot.slane %v3365_v14, 4  ;;  %v1203_v38 = vsel %vm579_vm5, %v3364_v15, %v1202_v16 }
 0x329   : > { %v591_v29 = vrot.slane %v3360_v19, 4  ;;  %v594_v30 = vsel %vm579_vm5, %v3360_v19, %v593_v17  ;;  %v1223_v37 = vperm.slane %v1215_v23, %v4012_v63  ;;  %v1211_v58 = vperm.slane %v1203_v38, %v4012_v63 }
 0x32a   : > { %v602_v33 = vperm.slane %v594_v30, %v4012_v63  ;;  %v1201_v42 = vsel %vm579_vm5, %v1200_v26, %v3345_v62  ;;  %v1213_v44 = vsel %vm579_vm5, %v1212_v36, %v3355_v60  ;;  %v4069_v62 = vunpack.c.0.s8 %v632_v22 }
 0x32b   : > { %v592_v34 = vsel %vm579_vm5, %v591_v29, %v3330_v2  ;;  %v1260_v56 = vrot.slane %v1223_v37, 4  ;;  %v1207_v57 = vperm.slane %v1201_v42, %v4012_v63  ;;  %v1262_v2 = vrot.slane %v1211_v58, 4 }
 0x32c   : > { %v4042_v39 = vperm.slane %v592_v34, %v4012_v63  ;;  %v639_v40 = vrot.slane %v602_v33, 4  ;;  %v4045_v41 = vsel %vm579_vm5, %v602_v33, %v641_v20  ;;  %v3350_v60 = vunpack.i.h.bf16 %v4017_v5 }
 0x32d   : > { %v4054_v49 = vpop.permute.xlu1 %3367  ;;  %v1250_v1 = vrot.slane %v1207_v57, 4  ;;  %v1261_v3 = vsel %vm579_vm5, %v1260_v56, %v1211_v58  ;;  %v1219_v4 = vperm.slane %v1213_v44, %v4012_v63  ;;  %v4078_v8 = vperm.slane %v1237_v55, %v4069_v62 }
 0x32e   : > { %v4058_v53 = vsel %vm579_vm5, %v4042_v39, %v629_v27  ;;  %v4061_v54 = vsel %vm579_vm5, %v639_v40, %v590_v6  ;;  %v1239_v6 = vsel %vm579_vm5, %v1199_v12, %v1238_v51  ;;  %v1263_v11 = vsel %vm579_vm5, %v1223_v37, %v1262_v2  ;;  %v711_v32 = vpop.permute.xlu0 %710 }
 0x32f   : > { %v4083_v14 = vperm.slane %v1261_v3, %v4069_v62  ;;  %v1271_v15 = vperm.slane %v1263_v11, %v4069_v62  ;;  %v4087_v16 = vperm.slane %v1227_v0, %v4069_v62  ;;  %v1251_v17 = vsel %vm579_vm5, %v1219_v4, %v1250_v1 }
 0x330   : > { %v737_v12 = vrot.slane %v708_v50, 4  ;;  %v727_v19 = vrot.slane %v3329_v61, 4  ;;  %v1247_v13 = vperm.slane %v1239_v6, %v4069_v62  ;;  %v3369_v21 = vunpack.i.l.bf16 %v4054_v49 }
 0x331   : > { %v1282_v22 = vrot.slane %v4078_v8, 4  ;;  %v1284_v23 = vrot.slane %v1271_v15, 4  ;;  %v4097_v26 = vperm.slane %v1251_v17, %v4069_v62  ;;  %v714_v27 = vsel %vm579_vm5, %v713_v45, %v3980_v25 }
 0x332   : > { %v1224_v29 = vrot.slane %v4051_v47, 4  ;;  %v725_v30 = vrot.slane %v3359_v10, 4  ;;  %v728_v31 = vsel %vm579_vm5, %v3359_v10, %v727_v19  ;;  %v1248_v33 = vrot.slane %v1219_v4, 4 }
 0x333   : > { %v1283_v34 = vsel %vm579_vm5, %v4083_v14, %v1282_v22  ;;  %v1285_v36 = vsel %vm579_vm5, %v1284_v23, %v1247_v13  ;;  %v1278_v37 = vrot.slane %v4087_v16, 4  ;;  %v738_v38 = vsel %vm579_vm5, %v737_v12, %v3349_v43 }
 0x334   : > { %v740_v40 = vsel %vm579_vm5, %v708_v50, %v739_v9  ;;  %v3396_v25 = vpack.i.bf16 %v1285_v36, %v1283_v34  ;;  %v1286_v42 = vrot.slane %v1247_v13, 4  ;;  %v749_v47 = vrot.slane %v711_v32, 4 }
 0x335   : > { %v4091_v20 = vpop.permute.xlu1 %3372  ;;  %v751_v48 = vrot.slane %v3369_v21, 4  ;;  %v1279_v51 = vsel %vm579_vm5, %v4097_v26, %v1278_v37  ;;  %v603_v55 = vrot.slane %v573_v24, 4  ;;  %v720_v44 = vperm.slane %v714_v27, %v4012_v63 }
 0x336   : > { %v4116_v56 = vperm.slane %v728_v31, %v4012_v63  ;;  %3397 = vrot.lane.b32.xlu2 %v3396_v25, %s3694_s14  ;;  %v1287_v43 = vsel %vm579_vm5, %v1271_v15, %v1286_v42  ;;  %v726_v50 = vsel %vm579_vm5, %v725_v30, %v3329_v61  ;;  %v1225_v59 = vsel %vm579_vm5, %v1224_v29, %v4032_v28 }
 0x337   : > { %v3391_v58 = vpack.i.bf16 %v1279_v51, %v1287_v43  ;;  %v1249_v0 = vsel %vm579_vm5, %v1248_v33, %v1207_v57  ;;  %v605_v1 = vrot.slane %v3350_v60, 4  ;;  %v1280_v3 = vrot.slane %v4083_v14, 4 }
 0x338   : > { %v1255_v2 = vperm.slane %v1249_v0, %v4069_v62  ;;  %v4129_v4 = vperm.slane %v740_v40, %v4012_v63  ;;  %v775_v6 = vrot.slane %v4110_v46, 4  ;;  %v750_v61 = vsel %vm579_vm5, %v749_v47, %v3369_v21 }
 0x339   : > { %v752_v9 = vsel %vm579_vm5, %v711_v32, %v751_v48  ;;  %3392 = vrot.lane.b32.xlu0 %v3391_v58, %s3694_s14  ;;  %v744_v28 = vperm.slane %v738_v38, %v4012_v63  ;;  %v732_v57 = vperm.slane %v726_v50, %v4012_v63  ;;  %v1231_v45 = vperm.slane %v1225_v59, %v4069_v62 }
 0x33a   : > { %v1272_v10 = vrot.slane %v1255_v2, 4  ;;  %v604_v14 = vsel %vm579_vm5, %v603_v55, %v3350_v60  ;;  %v606_v15 = vsel %vm579_vm5, %v573_v24, %v605_v1  ;;  %v763_v17 = vrot.slane %v720_v44, 4 }
 0x33b   : > { %v776_v12 = vsel %vm579_vm5, %v4116_v56, %v775_v6  ;;  %v756_v18 = vperm.slane %v750_v61, %v4012_v63  ;;  %v760_v19 = vperm.slane %v752_v9, %v4012_v63  ;;  %v1281_v21 = vsel %vm579_vm5, %v1280_v3, %v4078_v8 }
 0x33c   : > { %v1273_v13 = vsel %vm579_vm5, %v1272_v10, %v1231_v45  ;;  %v799_v22 = vrot.slane %v4129_v4, 4  ;;  %v787_v23 = vrot.slane %v744_v28, 4  ;;  %v4153_v60 = vperm.slane %v604_v14, %v4012_v63 }
 0x33d   : > { %v4138_v11 = vpop.permute.xlu1 %3387  ;;  %v3416_v5 = vpack.i.bf16 %v1273_v13, %v1281_v21  ;;  %v614_v27 = vperm.slane %v606_v15, %v4012_v63  ;;  %v764_v29 = vsel %vm579_vm5, %v732_v57, %v763_v17  ;;  %v3370_v30 = vunpack.i.h.bf16 %v4054_v49 }
 0x33e   : > { %v772_v31 = vperm.slane %v764_v29, %v4069_v62  ;;  %v784_v32 = vperm.slane %v776_v12, %v4069_v62  ;;  %v761_v8 = vrot.slane %v732_v57, 4  ;;  %v788_v24 = vsel %vm579_vm5, %v756_v18, %v787_v23 }
 0x33f   : > { %3417 = vrot.lane.b32.xlu1 %v3416_v5, %s3694_s14  ;;  %v800_v33 = vsel %vm579_vm5, %v760_v19, %v799_v22  ;;  %v785_v34 = vrot.slane %v756_v18, 4  ;;  %v796_v36 = vperm.slane %v788_v24, %v4069_v62  ;;  %v653_v38 = vrot.slane %v4153_v60, 4 }
 0x340   : > { %v808_v37 = vperm.slane %v800_v33, %v4069_v62  ;;  %v665_v40 = vrot.slane %v614_v27, 4  ;;  %v4168_v49 = vperm.slane %v4045_v41, %v4069_v62  ;;  %v815_v25 = vrot.slane %v772_v31, 4 }
 0x341   : > { %v773_v42 = vrot.slane %v4116_v56, 4  ;;  %v617_v47 = vrot.slane %v3370_v30, 4  ;;  %v797_v48 = vrot.slane %v760_v19, 4  ;;  %v823_v51 = vrot.slane %v784_v32, 4 }
 0x342   : > { %v816_v55 = vsel %vm579_vm5, %v796_v36, %v815_v25  ;;  %v1274_v43 = vrot.slane %v1231_v45, 4  ;;  %v1276_v50 = vrot.slane %v4097_v26, 4  ;;  %v762_v58 = vsel %vm579_vm5, %v761_v8, %v720_v44 }
 0x343   : > { %v824_v0 = vsel %vm579_vm5, %v808_v37, %v823_v51  ;;  %v768_v1 = vperm.slane %v762_v58, %v4069_v62  ;;  %v786_v41 = vsel %vm579_vm5, %v785_v34, %v744_v28  ;;  %v813_v3 = vrot.slane %v796_v36, 4 }
 0x344   : > { %v3401_v6 = vpack.i.bf16 %v816_v55, %v824_v0  ;;  %v1275_v56 = vsel %vm579_vm5, %v1255_v2, %v1274_v43  ;;  %v1277_v61 = vsel %vm579_vm5, %v1276_v50, %v4087_v16  ;;  %v792_v9 = vperm.slane %v786_v41, %v4069_v62 }
 0x345   : > { %v576_v59 = vpop.permute.xlu1 %575  ;;  %v3406_v57 = vpack.i.bf16 %v1277_v61, %v1275_v56  ;;  %v811_v26 = vrot.slane %v768_v1, 4  ;;  %v814_v44 = vsel %vm579_vm5, %v813_v3, %v772_v31  ;;  %v774_v28 = vsel %vm579_vm5, %v773_v42, %v4110_v46  ;;  %v3378_v61 = vpop.permute.xlu2 %3377 }
 0x346   : > { %v615_v45 = vrot.slane %v576_v59, 4  ;;  %3402 = vrot.lane.b32.xlu2 %v3401_v6, %s3694_s14  ;;  %v618_v10 = vsel %vm579_vm5, %v576_v59, %v617_v47  ;;  %v798_v2 = vsel %vm579_vm5, %v797_v48, %v4129_v4  ;;  %v809_v14 = vrot.slane %v792_v9, 4 }
 0x347   : > { %3407 = vrot.lane.b32.xlu0 %v3406_v57, %s3694_s14  ;;  %v812_v16 = vsel %vm579_vm5, %v792_v9, %v811_v26  ;;  %v626_v17 = vperm.slane %v618_v10, %v4012_v63  ;;  %v780_v12 = vperm.slane %v774_v28, %v4069_v62  ;;  %v627_v18 = vrot.slane %v4042_v39, 4  ;;  %v3383_v9 = vpop.permute.xlu0 %3382 }
 0x348   : > { %v616_v15 = vsel %vm579_vm5, %v615_v45, %v3370_v30  ;;  %v3421_v19 = vpack.i.bf16 %v814_v44, %v812_v16  ;;  %v804_v46 = vperm.slane %v798_v2, %v4069_v62  ;;  %v821_v5 = vrot.slane %v808_v37, 4 }
 0x349   : > { %v622_v13 = vperm.slane %v616_v15, %v4012_v63  ;;  %v663_v21 = vrot.slane %v626_v17, 4  ;;  %v666_v4 = vsel %vm579_vm5, %v626_v17, %v665_v40  ;;  %v819_v22 = vrot.slane %v780_v12, 4 }
 0x34a   : > { %v638_v23 = vperm.slane %v4058_v53, %v4069_v62  ;;  %3422 = vrot.lane.b32.xlu1 %v3421_v19, %s3694_s14  ;;  %v817_v31 = vrot.slane %v804_v46, 4  ;;  %v810_v8 = vsel %vm579_vm5, %v809_v14, %v768_v1  ;;  %v822_v33 = vsel %vm579_vm5, %v821_v5, %v784_v32 }
 0x34b   : > { %v651_v29 = vrot.slane %v622_v13, 4  ;;  %v654_v30 = vsel %vm579_vm5, %v622_v13, %v653_v38  ;;  %v664_v39 = vsel %vm579_vm5, %v663_v21, %v614_v27  ;;  %v820_v24 = vsel %vm579_vm5, %v804_v46, %v819_v22 }
 0x34c   : > { %v670_v36 = vperm.slane %v664_v39, %v4069_v62  ;;  %v674_v53 = vperm.slane %v666_v4, %v4069_v62  ;;  %v818_v37 = vsel %vm579_vm5, %v817_v31, %v780_v12  ;;  %v662_v40 = vperm.slane %v654_v30, %v4069_v62 }
 0x34d   : > { %v652_v34 = vsel %vm579_vm5, %v651_v29, %v4153_v60  ;;  %v3426_v27 = vpack.i.bf16 %v810_v8, %v818_v37  ;;  %v3411_v25 = vpack.i.bf16 %v822_v33, %v820_v24  ;;  %v681_v32 = vrot.slane %v638_v23, 4 }
 0x34e   : > { %v658_v38 = vperm.slane %v652_v34, %v4069_v62  ;;  %v683_v42 = vrot.slane %v670_v36, 4  ;;  %v689_v60 = vrot.slane %v4168_v49, 4  ;;  %v628_v47 = vsel %vm579_vm5, %v627_v18, %v4021_v7 }
 0x34f   : > { %3427 = vrot.lane.b32.xlu2 %v3426_v27, %s3694_s14  ;;  %3412 = vrot.lane.b32.xlu0 %v3411_v25, %s3694_s14  ;;  %v646_v48 = vperm.slane %v4061_v54, %v4069_v62  ;;  %v634_v51 = vperm.slane %v628_v47, %v4069_v62  ;;  %v4221_v55 = vsel %vm579_vm5, %v662_v40, %v681_v32  ;;  %v687_v59 = vrot.slane %v674_v53, 4 }
 0x350   : > { %v4224_v43 = vsel %vm579_vm5, %v674_v53, %v689_v60  ;;  %v675_v50 = vrot.slane %v658_v38, 4  ;;  %v679_v1 = vrot.slane %v662_v40, 4  ;;  %v3374_v57 = vunpack.i.l.bf16 %v4091_v20 }
 0x351   : > { %v4227_v58 = vsel %vm579_vm5, %v683_v42, %v646_v48  ;;  %v677_v54 = vrot.slane %v634_v51, 4  ;;  %v685_v41 = vrot.slane %v646_v48, 4  ;;  %v4238_v3 = vsel %vm579_vm5, %v687_v59, %v4168_v49 }
 0x352   : > { %1461 = vrot.lane.b32.xlu1 %v3957_v52, %s3695_s28  ;;  %v4231_v7 = vsel %vm579_vm5, %v675_v50, %v634_v51  ;;  %v4244_v6 = vsel %vm579_vm5, %v679_v1, %v638_v23  ;;  %v3375_v49 = vunpack.i.h.bf16 %v4091_v20  ;;  %v3380_v26 = vunpack.i.h.bf16 %v3378_v61 }
 0x353   : > { %v4234_v0 = vsel %vm579_vm5, %v658_v38, %v677_v54  ;;  %v4247_v56 = vsel %vm579_vm5, %v670_v36, %v685_v41  ;;  %v3385_v44 = vunpack.i.h.bf16 %v3383_v9  ;;  %v3384_v10 = vunpack.i.l.bf16 %v3383_v9 }
 0x354   : > { %v1039_v45 = vrot.slane %v3375_v49, 4  ;;  %v1027_v28 = vrot.slane %v3374_v57, 4  ;;  %v3390_v2 = vunpack.i.h.bf16 %v4138_v11  ;;  %v3389_v14 = vunpack.i.l.bf16 %v4138_v11 }
 0x355   : > { %v1051_v16 = vrot.slane %v3380_v26, 4  ;;  %v3379_v15 = vunpack.i.l.bf16 %v3378_v61  ;;  %v1063_v17 = vrot.slane %v3385_v44, 4  ;;  %v1037_v21 = vrot.slane %v3384_v10, 4 }
 0x356   : > { %v1040_v12 = vsel %vm579_vm5, %v3384_v10, %v1039_v45  ;;  %v1061_v4 = vrot.slane %v3390_v2, 4  ;;  %v1049_v31 = vrot.slane %v3389_v14, 4 }
 0x357   : > { %1464 = vrot.lane.b32.xlu2 %v3957_v52, %s3696_s18  ;;  %1458 = vrot.lane.b32.xlu0 %v3957_v52, %s3682_s17  ;;  %v1028_v19 = vsel %vm579_vm5, %v3379_v15, %v1027_v28  ;;  %v1064_v20 = vsel %vm579_vm5, %v3390_v2, %v1063_v17  ;;  %v1052_v13 = vsel %vm579_vm5, %v3389_v14, %v1051_v16  ;;  %v1025_v22 = vrot.slane %v3379_v15, 4  ;;  %s3699_s17 = smov 8   ;;  %s2863_s18 = scalar_lea.hbm %s5084_s9, %s3149_s27 }
 0x358   : > { %v1048_v46 = vperm.slane %v1040_v12, %v4012_v63  ;;  %v1036_v11 = vperm.slane %v1028_v19, %v4012_v63  ;;  %v1072_v5 = vperm.slane %v1064_v20, %v4012_v63  ;;  %v1060_v23 = vperm.slane %v1052_v13, %v4012_v63 }
 0x359   : > { %v1026_v30 = vsel %vm579_vm5, %v1025_v22, %v3374_v57  ;;  %v1038_v39 = vsel %vm579_vm5, %v1037_v21, %v3375_v49  ;;  %v1062_v8 = vsel %vm579_vm5, %v1061_v4, %v3385_v44  ;;  %v1050_v40 = vsel %vm579_vm5, %v1049_v31, %v3380_v26 }
 0x35a   : > { %1452 = vrot.lane.b32.xlu1 %v3957_v52, %s3685_s8  ;;  %v1085_v29 = vrot.slane %v1048_v46, 4  ;;  %v1087_v24 = vrot.slane %v1036_v11, 4  ;;  %v1109_v33 = vrot.slane %v1072_v5, 4  ;;  %v1111_v34 = vrot.slane %v1060_v23, 4  ;;  %s3700_s8 = smov 24  }
 0x35b   : > { %v1032_v36 = vperm.slane %v1026_v30, %v4012_v63  ;;  %v1044_v53 = vperm.slane %v1038_v39, %v4012_v63  ;;  %v1068_v38 = vperm.slane %v1062_v8, %v4012_v63  ;;  %v1056_v48 = vperm.slane %v1050_v40, %v4012_v63 }
 0x35c   : > { %v1086_v37 = vsel %vm579_vm5, %v1085_v29, %v1036_v11  ;;  %v1088_v25 = vsel %vm579_vm5, %v1048_v46, %v1087_v24  ;;  %v1110_v42 = vsel %vm579_vm5, %v1109_v33, %v1060_v23  ;;  %v1112_v32 = vsel %vm579_vm5, %v1072_v5, %v1111_v34 }
 0x35d   : > { %v1075_v60 = vrot.slane %v1032_v36, 4  ;;  %v1092_v47 = vperm.slane %v1086_v37, %v4069_v62  ;;  %v1073_v51 = vrot.slane %v1044_v53, 4  ;;  %v1097_v50 = vrot.slane %v1068_v38, 4 }
 0x35e   : > { %v1116_v59 = vperm.slane %v1110_v42, %v4069_v62  ;;  %v1120_v54 = vperm.slane %v1112_v32, %v4069_v62  ;;  %v1096_v1 = vperm.slane %v1088_v25, %v4069_v62  ;;  %v1099_v61 = vrot.slane %v1056_v48, 4 }
 0x35f   : > { %1467 = vrot.lane.b32.xlu2 %v3957_v52, %s3697_s20  ;;  %1449 = vrot.lane.b32.xlu0 %v3957_v52, %s3686_s22  ;;  %v1076_v49 = vsel %vm579_vm5, %v1044_v53, %v1075_v60  ;;  %v1131_v9 = vrot.slane %v1092_v47, 4  ;;  %v1074_v57 = vsel %vm579_vm5, %v1073_v51, %v1032_v36  ;;  %v1098_v26 = vsel %vm579_vm5, %v1097_v50, %v1056_v48  ;;  %s3701_s22 = smov 40   ;;  %s395_s20 = scalar_lea.vmem [#allocation10], %s2976_s24 }
 0x360   : > { %v1133_v45 = vrot.slane %v1120_v54, 4  ;;  %v1135_v28 = vrot.slane %v1096_v1, 4  ;;  %v1084_v14 = vperm.slane %v1076_v49, %v4069_v62  ;;  %v1080_v12 = vperm.slane %v1074_v57, %v4069_v62  ;;  %s3620_s24 = scalar_lea.hbm %s5084_s9, 16 }
 0x361   : > { %v1132_v44 = vsel %vm579_vm5, %v1116_v59, %v1131_v9  ;;  %v1100_v19 = vsel %vm579_vm5, %v1068_v38, %v1099_v61  ;;  %v1104_v20 = vperm.slane %v1098_v26, %v4069_v62  ;;  %v1129_v21 = vrot.slane %v1116_v59, 4 }
 0x362   : > { %v1136_v13 = vsel %vm579_vm5, %v1120_v54, %v1135_v28  ;;  %v1134_v4 = vsel %vm579_vm5, %v1133_v45, %v1096_v1  ;;  %v1108_v5 = vperm.slane %v1100_v19, %v4069_v62  ;;  %v1127_v23 = vrot.slane %v1084_v14, 4 }
 0x363   : > { %v1472_v29 = vrot.slane %v3957_v52, 4  ;;  %v1121_v39 = vrot.slane %v1104_v20, 4  ;;  %v1123_v24 = vrot.slane %v1080_v12, 4  ;;  %v1130_v36 = vsel %vm579_vm5, %v1129_v21, %v1092_v47 }
 0x364   : > { %v1128_v32 = vsel %vm579_vm5, %v1108_v5, %v1127_v23  ;;  %v1125_v51 = vrot.slane %v1108_v5, 4 }
 0x367   : > { %1455 = vrot.lane.b32.xlu0 %v3957_v52, %s3688_s15  ;;  %s3702_s15 = smov 48  }
 0x390   : > { %v4261_v18 = vpop.permute.xlu2 %3397 }
 0x391   : > { %v3399_v41 = vunpack.i.l.bf16 %v4261_v18  ;;  %v3400_v16 = vunpack.i.h.bf16 %v4261_v18 }
 0x393   : > { %v1325_v15 = vsel %vm857_vm6, %v1132_v44, %v3399_v41  ;;  %v1326_v18 = vsel %vm857_vm6, %v1134_v4, %v3400_v16 }
 0x394   : > { %v1366_v22 = vrot.slane %v1325_v15, 4  ;;  %v1352_v37 = vrot.slane %v1326_v18, 4 }
 0x3a0   : > { %v4278_v27 = vpop.permute.xlu2 %3402 }
 0x3a1   : > { %v3405_v33 = vunpack.i.h.bf16 %v4278_v27  ;;  %v3404_v38 = vunpack.i.l.bf16 %v4278_v27  ;;  %v1122_v27 = vsel %vm579_vm5, %v1121_v39, %v1080_v12 }
 0x3a3   : > { %v4319_v1 = vsel %vm857_vm6, %v4221_v55, %v3405_v33  ;;  %v4325_v61 = vsel %vm857_vm6, %v4224_v43, %v3404_v38 }
 0x3a4   : > { %v878_v12 = vrot.slane %v4319_v1, 4  ;;  %v902_v19 = vrot.slane %v4325_v61, 4 }
 0x3a9   : > { %v3428_v10 = vpop.permute.xlu2 %3427 }
 0x3aa   : > { %v3430_v40 = vunpack.i.h.bf16 %v3428_v10  ;;  %v3429_v25 = vunpack.i.l.bf16 %v3428_v10 }
 0x3ab   : > { %v3393_v2 = vpop.permute.xlu0 %3392 }
 0x3ac   : > { %v3394_v17 = vunpack.i.l.bf16 %v3393_v2  ;;  %v3395_v50 = vunpack.i.h.bf16 %v3393_v2  ;;  %v858_v9 = vsel %vm857_vm6, %v4231_v7, %v3430_v40  ;;  %v4331_v57 = vsel %vm857_vm6, %v4227_v58, %v3429_v25 }
 0x3ad   : > { %v1124_v2 = vsel %vm579_vm5, %v1104_v20, %v1123_v24  ;;  %v1126_v7 = vsel %vm579_vm5, %v1125_v51, %v1084_v14 }
 0x3ae   : > { %v1327_v46 = vsel %vm857_vm6, %v1136_v13, %v3394_v17  ;;  %v1323_v28 = vsel %vm857_vm6, %v1128_v32, %v3395_v50  ;;  %v868_v13 = vrot.slane %v858_v9, 4 }
 0x3af   : > { %v1364_v11 = vrot.slane %v1327_v46, 4  ;;  %v1367_v31 = vsel %vm579_vm5, %v1327_v46, %v1366_v22  ;;  %v892_v46 = vrot.slane %v4331_v57, 4  ;;  %v1340_v4 = vrot.slane %v1323_v28, 4 }
 0x3b0   : > { %v1375_v60 = vperm.slane %v1367_v31, %v4012_v63 }
 0x3b1   : > { %v1365_v30 = vsel %vm579_vm5, %v1364_v11, %v1325_v15  ;;  %v3418_v8 = vpop.permute.xlu1 %3417  ;;  %v4311_v42 = vpop.permute.xlu2 %1464 }
 0x3b2   : > { %v1371_v34 = vperm.slane %v1365_v30, %v4012_v63  ;;  %v3419_v53 = vunpack.i.l.bf16 %v3418_v8  ;;  %v3420_v59 = vunpack.i.h.bf16 %v3418_v8  ;;  %v1412_v55 = vrot.slane %v1375_v60, 4 }
 0x3b3   : > { %v1494_v11 = vrot.slane %v4311_v42, 4 }
 0x3b4   : > { %v1324_v48 = vsel %vm857_vm6, %v1130_v36, %v3419_v53  ;;  %v1400_v49 = vrot.slane %v1371_v34, 4  ;;  %v1320_v43 = vsel %vm857_vm6, %v1122_v27, %v3420_v59 }
 0x3b5   : > { %v1353_v54 = vsel %vm579_vm5, %v1352_v37, %v1324_v48  ;;  %v1354_v47 = vrot.slane %v1324_v48, 4 }
 0x3b6   : > { %v1359_v41 = vperm.slane %v1353_v54, %v4012_v63 }
 0x3b7   : > { %v1355_v26 = vsel %vm579_vm5, %v1326_v18, %v1354_v47  ;;  %v1330_v18 = vrot.slane %v1320_v43, 4 }
 0x3b8   : > { %v1402_v44 = vrot.slane %v1359_v41, 4  ;;  %v1401_v45 = vsel %vm579_vm5, %v1400_v49, %v1359_v41  ;;  %v1363_v10 = vperm.slane %v1355_v26, %v4012_v63 }
 0x3b9   : > { %v4341_v16 = vperm.slane %v1401_v45, %v4069_v62  ;;  %v3408_v21 = vpop.permute.xlu0 %3407  ;;  %v4350_v5 = vpop.permute.xlu2 %1467 }
 0x3ba   : > { %v1403_v58 = vsel %vm579_vm5, %v1371_v34, %v1402_v44  ;;  %v1413_v15 = vsel %vm579_vm5, %v1412_v55, %v1363_v10  ;;  %v1414_v17 = vrot.slane %v1363_v10, 4  ;;  %v3410_v20 = vunpack.i.h.bf16 %v3408_v21 }
 0x3bb   : > { %v3409_v22 = vunpack.i.l.bf16 %v3408_v21  ;;  %v4353_v23 = vperm.slane %v1403_v58, %v4069_v62  ;;  %v4356_v30 = vperm.slane %v1413_v15, %v4069_v62  ;;  %v1424_v24 = vrot.slane %v4341_v16, 4 }
 0x3bc   : > { %v1415_v14 = vsel %vm579_vm5, %v1375_v60, %v1414_v17  ;;  %v1322_v31 = vsel %vm857_vm6, %v1126_v7, %v3410_v20  ;;  %v3423_v8 = vpop.permute.xlu1 %3422  ;;  %v1506_v38 = vrot.slane %v4350_v5, 4 }
 0x3bd   : > { %v1321_v39 = vsel %vm857_vm6, %v1124_v2, %v3409_v22  ;;  %v4362_v33 = vperm.slane %v1415_v14, %v4069_v62  ;;  %v1328_v34 = vrot.slane %v1322_v31, 4  ;;  %v1331_v36 = vsel %vm579_vm5, %v1322_v31, %v1330_v18 }
 0x3be   : > { %v1341_v53 = vsel %vm579_vm5, %v1340_v4, %v1321_v39  ;;  %v1342_v37 = vrot.slane %v1321_v39, 4  ;;  %v3425_v25 = vunpack.i.h.bf16 %v3423_v8  ;;  %v3424_v32 = vunpack.i.l.bf16 %v3423_v8 }
 0x3bf   : > { %v4368_v40 = vperm.slane %v1341_v53, %v4012_v63  ;;  %v1329_v60 = vsel %vm579_vm5, %v1328_v34, %v1320_v43  ;;  %v4372_v48 = vperm.slane %v1331_v36, %v4012_v63  ;;  %v1428_v51 = vrot.slane %v4353_v23, 4 }
 0x3c0   : > { %v1432_v50 = vrot.slane %v4356_v30, 4  ;;  %v1343_v59 = vsel %vm579_vm5, %v1323_v28, %v1342_v37  ;;  %v860_v47 = vsel %vm857_vm6, %v4244_v6, %v3425_v25  ;;  %v1436_v27 = vrot.slane %v4362_v33, 4 }
 0x3c1   : > { %v1376_v54 = vrot.slane %v4368_v40, 4  ;;  %v866_v41 = vrot.slane %v860_v47, 4  ;;  %v869_v49 = vsel %vm579_vm5, %v860_v47, %v868_v13  ;;  %v859_v26 = vsel %vm857_vm6, %v4234_v0, %v3424_v32  ;;  %v3413_v55 = vpop.permute.xlu0 %3412 }
 0x3c2   : > { %v4385_v44 = vperm.slane %v1329_v60, %v4012_v63  ;;  %v877_v45 = vperm.slane %v869_v49, %v4012_v63  ;;  %v879_v10 = vsel %vm579_vm5, %v878_v12, %v859_v26  ;;  %v880_v28 = vrot.slane %v859_v26, 4 }
 0x3c3   : > { %v3415_v43 = vunpack.i.h.bf16 %v3413_v55  ;;  %v4390_v6 = vperm.slane %v1343_v59, %v4012_v63  ;;  %v1390_v2 = vrot.slane %v4372_v48, 4  ;;  %v867_v7 = vsel %vm579_vm5, %v866_v41, %v858_v9 }
 0x3c4   : > { %v3414_v58 = vunpack.i.l.bf16 %v3413_v55  ;;  %v928_v15 = vrot.slane %v877_v45, 4  ;;  %v881_v0 = vsel %vm579_vm5, %v4319_v1, %v880_v28  ;;  %v4397_v17 = vperm.slane %v879_v10, %v4012_v63  ;;  %v1462_v13 = vpop.permute.xlu1 %1461 }
 0x3c5   : > { %v864_v12 = vsel %vm857_vm6, %v4238_v3, %v3415_v43  ;;  %v889_v21 = vperm.slane %v881_v0, %v4012_v63  ;;  %v1377_v9 = vsel %vm579_vm5, %v1376_v54, %v4385_v44  ;;  %v4406_v22 = vperm.slane %v867_v7, %v4012_v63 }
 0x3c6   : > { %v890_v4 = vrot.slane %v864_v12, 4  ;;  %v893_v20 = vsel %vm579_vm5, %v864_v12, %v892_v46  ;;  %v863_v14 = vsel %vm857_vm6, %v4247_v56, %v3414_v58  ;;  %v1507_v3 = vsel %vm579_vm5, %v1506_v38, %v1462_v13 }
 0x3c7   : > { %v4409_v1 = vperm.slane %v893_v20, %v4012_v63  ;;  %v926_v18 = vrot.slane %v889_v21, 4  ;;  %v929_v31 = vsel %vm579_vm5, %v889_v21, %v928_v15  ;;  %v903_v39 = vsel %vm579_vm5, %v902_v19, %v863_v14 }
 0x3c8   : > { %v891_v46 = vsel %vm579_vm5, %v890_v4, %v4331_v57  ;;  %v914_v8 = vrot.slane %v4397_v17, 4  ;;  %v904_v36 = vrot.slane %v863_v14, 4  ;;  %v909_v37 = vperm.slane %v903_v39, %v4012_v63 }
 0x3c9   : > { %v4422_v34 = vperm.slane %v891_v46, %v4012_v63  ;;  %v952_v56 = vrot.slane %v4409_v1, 4  ;;  %v4426_v53 = vsel %vm579_vm5, %v926_v18, %v877_v45  ;;  %v1508_v38 = vrot.slane %v1462_v13, 4  ;;  %v1459_v25 = vpop.permute.xlu0 %1458 }
 0x3ca   : > { %v1513_v57 = vperm.slane %v1507_v3, %v4012_v63  ;;  %v905_v32 = vsel %vm579_vm5, %v4325_v61, %v904_v36  ;;  %v1495_v60 = vsel %vm579_vm5, %v1494_v11, %v1459_v25  ;;  %v1496_v59 = vrot.slane %v1459_v25, 4 }
 0x3cb   : > { %v940_v19 = vrot.slane %v4422_v34, 4  ;;  %v916_v54 = vrot.slane %v4406_v22, 4  ;;  %v4438_v47 = vperm.slane %v905_v32, %v4012_v63  ;;  %v1509_v41 = vsel %vm579_vm5, %v4350_v5, %v1508_v38 }
 0x3cc   : > { %v1542_v49 = vrot.slane %v1513_v57, 4  ;;  %v1517_v55 = vperm.slane %v1509_v41, %v4012_v63  ;;  %v1497_v61 = vsel %vm579_vm5, %v4311_v42, %v1496_v59  ;;  %v1501_v11 = vperm.slane %v1495_v60, %v4012_v63  ;;  %v1453_v45 = vpop.permute.xlu1 %1452 }
 0x3cd   : > { %v4443_v26 = vsel %vm579_vm5, %v909_v37, %v940_v19  ;;  %v4450_v10 = vperm.slane %v929_v31, %v4069_v62  ;;  %v4454_v28 = vsel %vm579_vm5, %v4438_v47, %v952_v56  ;;  %v1505_v5 = vperm.slane %v1497_v61, %v4012_v63 }
 0x3ce   : > { %v1383_v43 = vperm.slane %v1377_v9, %v4069_v62  ;;  %v1554_v7 = vrot.slane %v1517_v55, 4  ;;  %v1543_v58 = vsel %vm579_vm5, %v1542_v49, %v1501_v11  ;;  %v1544_v15 = vrot.slane %v1501_v11, 4 }
 0x3cf   : > { %v1470_v0 = vrot.slane %v1453_v45, 4  ;;  %v4460_v42 = vperm.slane %v1543_v58, %v4069_v62  ;;  %v1556_v12 = vrot.slane %v1505_v5, 4  ;;  %v1473_v21 = vsel %vm579_vm5, %v1453_v45, %v1472_v29 }
 0x3d0   : > { %v1425_v13 = vsel %vm579_vm5, %v1424_v24, %v1383_v43  ;;  %v1545_v4 = vsel %vm579_vm5, %v1513_v57, %v1544_v15  ;;  %v1555_v20 = vsel %vm579_vm5, %v1554_v7, %v1505_v5  ;;  %v938_v3 = vrot.slane %v909_v37, 4 }
 0x3d1   : > { %v1440_v9 = vpack.c.bf16 %v1425_v13, %v1425_v13  ;;  %v1471_v14 = vsel %vm579_vm5, %v1470_v0, %v3957_v52  ;;  %v4473_v18 = vperm.slane %v1545_v4, %v4069_v62  ;;  %v1557_v31 = vsel %vm579_vm5, %v1517_v55, %v1556_v12  ;;  %v4479_v46 = vpop.permute.xlu0 %1449 }
 0x3d2   : > { %v4477_v24 = vperm.slane %v1555_v20, %v4069_v62  ;;  %v950_v29 = vrot.slane %v4438_v47, 4  ;;  %v4483_v39 = vperm.slane %v1557_v31, %v4069_v62  ;;  %v4487_v52 = vperm.slane %v1471_v14, %v4012_v63 }
 0x3d3   : > { %v1713_v56 = vsel %vm1708_vm7, %v1440_v9, 0  ;;  %v1566_v36 = vrot.slane %v4460_v42, 4  ;;  %v4491_v37 = vperm.slane %v1473_v21, %v4012_v63  ;;  %v1426_v38 = vrot.slane %v1383_v43, 4 }
 0x3d4   : > { %1722 = vmatpush.bf16.xpose.msra.mxu2 %v1713_v56  ;;  %v1378_v57 = vrot.slane %v4385_v44, 4  ;;  %v1570_v25 = vrot.slane %v4473_v18, 4  ;;  %v1574_v19 = vrot.slane %v4477_v24, 4  ;;  %v1578_v32 = vrot.slane %v4483_v39, 4 }
 0x3d5   : > { %v1388_v60 = vrot.slane %v4390_v6, 4  ;;  %v1520_v59 = vrot.slane %v4487_v52, 4  ;;  %v1427_v47 = vsel %vm579_vm5, %v4341_v16, %v1426_v38  ;;  %v915_v49 = vsel %vm579_vm5, %v914_v8, %v4406_v22 }
 0x3d6   : > { %v1379_v41 = vsel %vm579_vm5, %v4368_v40, %v1378_v57  ;;  %v1441_v44 = vpack.c.bf16 %v1427_v47, %v1427_v47  ;;  %v921_v11 = vperm.slane %v915_v49, %v4069_v62  ;;  %v939_v5 = vsel %vm579_vm5, %v938_v3, %v4422_v34 }
 0x3d7   : > { %v1387_v55 = vperm.slane %v1379_v41, %v4069_v62  ;;  %v1389_v61 = vsel %vm579_vm5, %v1388_v60, %v4372_v48  ;;  %v1391_v16 = vsel %vm579_vm5, %v4390_v6, %v1390_v2  ;;  %v933_v40 = vperm.slane %v4426_v53, %v4069_v62 }
 0x3d8   : > { %v1395_v45 = vperm.slane %v1389_v61, %v4069_v62  ;;  %v1732_v8 = vsel %vm1708_vm7, %v1441_v44, 0  ;;  %v945_v58 = vperm.slane %v939_v5, %v4069_v62  ;;  %v964_v0 = vrot.slane %v921_v11, 4 }
 0x3d9   : > { %v1429_v43 = vsel %vm579_vm5, %v1428_v51, %v1387_v55  ;;  %v1430_v7 = vrot.slane %v1387_v55, 4  ;;  %1741 = vmatpush.bf16.xpose.msra.mxu3 %v1732_v8  ;;  %v1399_v12 = vperm.slane %v1391_v16, %v4069_v62  ;;  %v1456_v20 = vpop.permute.xlu0 %1455  ;;  %v951_v38 = vsel %vm579_vm5, %v950_v29, %v4409_v1 }
 0x3da   : > { %v1442_v15 = vpack.c.bf16 %v1429_v43, %v1429_v43  ;;  %v1434_v34 = vrot.slane %v1395_v45, 4  ;;  %v1433_v48 = vsel %vm579_vm5, %v1432_v50, %v1395_v45  ;;  %v962_v2 = vrot.slane %v945_v58, 4 }
 0x3db   : > { %v1431_v6 = vsel %vm579_vm5, %v4353_v23, %v1430_v7  ;;  %v1444_v53 = vpack.c.bf16 %v1433_v48, %v1433_v48  ;;  %v965_v4 = vsel %vm579_vm5, %v945_v58, %v964_v0  ;;  %v1484_v50 = vrot.slane %v4479_v46, 4 }
 0x3dc   : > { %v1751_v51 = vsel %vm1708_vm7, %v1442_v15, 0  ;;  %v1443_v13 = vpack.c.bf16 %v1431_v6, %v1431_v6  ;;  %v1435_v21 = vsel %vm579_vm5, %v4356_v30, %v1434_v34  ;;  %v963_v14 = vsel %vm579_vm5, %v962_v2, %v921_v11 }
 0x3dd   : > { %1760 = vmatpush.bf16.xpose.msrb.mxu2 %v1751_v51  ;;  %v1445_v9 = vpack.c.bf16 %v1435_v21, %v1435_v21  ;;  %v979_v23 = vpack.c.bf16 %v965_v4, %v965_v4  ;;  %v978_v31 = vpack.c.bf16 %v963_v14, %v963_v14  ;;  %v1438_v56 = vrot.slane %v1399_v12, 4 }
 0x3de   : > { %v1770_v3 = vsel %vm1708_vm7, %v1443_v13, 0  ;;  %v957_v57 = vperm.slane %v951_v38, %v4069_v62  ;;  %v972_v60 = vrot.slane %v933_v40, 4  ;;  %v1482_v47 = vrot.slane %v1456_v20, 4 }
 0x3df   : > { %v1808_v30 = vsel %vm1708_vm7, %v1445_v9, 0  ;;  %3015 = vmatmul.msk.bf16.vlgmr.msra.gmra.mxu2 %vm1708_vm7, %v978_v31  ;;  %v1789_v41 = vsel %vm1708_vm7, %v1444_v53, 0  ;;  %v1439_v49 = vsel %vm579_vm5, %v4362_v33, %v1438_v56  ;;  %v1485_v44 = vsel %vm579_vm5, %v1456_v20, %v1484_v50 }
 0x3e0   : > { %1817 = vmatpush.bf16.xpose.msrb.mxu1 %v1808_v30  ;;  %v917_v1 = vsel %vm579_vm5, %v4397_v17, %v916_v54  ;;  %3016 = vmatmul.msk.bf16.vlgmr.msra.gmra.mxu3 %vm1708_vm7, %v979_v23  ;;  %v1447_v29 = vpack.c.bf16 %v1439_v49, %v1439_v49  ;;  %v970_v55 = vrot.slane %v957_v57, 4  ;;  %v973_v61 = vsel %vm579_vm5, %v957_v57, %v972_v60 }
 0x3e1   : > { %1779 = vmatpush.bf16.xpose.msrb.mxu3 %v1770_v3  ;;  %v1483_v11 = vsel %vm579_vm5, %v1482_v47, %v4479_v46  ;;  %v1532_v45 = vrot.slane %v4491_v37, 4  ;;  %v1493_v16 = vperm.slane %v1485_v44, %v4012_v63  ;;  %v925_v22 = vperm.slane %v917_v1, %v4069_v62 }
 0x3e2   : > { %v1489_v5 = vperm.slane %v1483_v11, %v4012_v63  ;;  %v1846_v17 = vsel %vm1708_vm7, %v1447_v29, 0  ;;  %v983_v54 = vpack.c.bf16 %v973_v61, %v973_v61  ;;  %v949_v8 = vperm.slane %v4443_v26, %v4069_v62 }
 0x3e3   : > { %v4561_v43 = vsel %vm579_vm5, %v970_v55, %v933_v40  ;;  %v1530_v58 = vrot.slane %v1493_v16, 4  ;;  %v1533_v15 = vsel %vm579_vm5, %v1493_v16, %v1532_v45  ;;  %v1437_v26 = vsel %vm579_vm5, %v1436_v27, %v1399_v12 }
 0x3e4   : > { %v1518_v7 = vrot.slane %v1489_v5, 4  ;;  %v1521_v46 = vsel %vm579_vm5, %v1489_v5, %v1520_v59  ;;  %v1541_v0 = vperm.slane %v1533_v15, %v4069_v62  ;;  %v966_v48 = vrot.slane %v949_v8, 4 }
 0x3e5   : > { %1798 = vmatpush.bf16.xpose.msra.mxu2 %v1789_v41  ;;  %v1529_v34 = vperm.slane %v1521_v46, %v4069_v62  ;;  %v1531_v6 = vsel %vm579_vm5, %v1530_v58, %v4491_v37  ;;  %v968_v2 = vrot.slane %v925_v22, 4  ;;  %v976_v59 = vrot.slane %v4450_v10, 4 }
 0x3e6   : > { %v1519_v40 = vsel %vm579_vm5, %v1518_v7, %v4487_v52  ;;  %v1537_v51 = vperm.slane %v1531_v6, %v4069_v62  ;;  %v1579_v52 = vsel %vm579_vm5, %v1578_v32, %v1541_v0  ;;  %v1580_v12 = vrot.slane %v1541_v0, 4 }
 0x3e7   : > { %3020 = vmatmul.msk.bf16.vlgmr.msrb.gmra.mxu1 %vm1708_vm7, %v983_v54  ;;  %v1525_v53 = vperm.slane %v1519_v40, %v4069_v62  ;;  %v1571_v33 = vsel %vm579_vm5, %v1570_v25, %v1529_v34  ;;  %v1572_v27 = vrot.slane %v1529_v34, 4  ;;  %v967_v37 = vsel %vm579_vm5, %v966_v48, %v925_v22 }
 0x3e8   : > { %v1446_v13 = vpack.c.bf16 %v1437_v26, %v1437_v26  ;;  %v1575_v25 = vsel %vm579_vm5, %v1574_v19, %v1537_v51  ;;  %v1582_v20 = vrot.slane %v1571_v33, 4  ;;  %v1576_v50 = vrot.slane %v1537_v51, 4 }
 0x3e9   : > { %1855 = vmatpush.bf16.xpose.msra.mxu3 %v1846_v17  ;;  %v1567_v21 = vsel %vm579_vm5, %v1566_v36, %v1525_v53  ;;  %v1573_v4 = vsel %vm579_vm5, %v4473_v18, %v1572_v27  ;;  %v1568_v9 = vrot.slane %v1525_v53, 4  ;;  %v1581_v32 = vsel %vm579_vm5, %v4483_v39, %v1580_v12 }
 0x3ea   : > { %v1584_v14 = vrot.slane %v1567_v21, 4  ;;  %v1594_v23 = vrot.slane %v1573_v4, 4  ;;  %v1606_v3 = vrot.slane %v1579_v52, 4  ;;  %v1608_v31 = vrot.slane %v1575_v25, 4 }
 0x3eb   : > { %v1618_v56 = vrot.slane %v1581_v32, 4  ;;  %v1577_v36 = vsel %vm579_vm5, %v4477_v24, %v1576_v50  ;;  %v980_v38 = vpack.c.bf16 %v967_v37, %v967_v37  ;;  %v969_v18 = vsel %vm579_vm5, %v949_v8, %v968_v2 }
 0x3ec   : > { %v4602_v19 = vperm.slane %v4454_v28, %v4069_v62  ;;  %v1607_v30 = vsel %vm579_vm5, %v1606_v3, %v1575_v25  ;;  %v1609_v57 = vsel %vm579_vm5, %v1579_v52, %v1608_v31  ;;  %v1620_v39 = vrot.slane %v1577_v36, 4 }
 0x3ed   : > { %v1827_v60 = vsel %vm1708_vm7, %v1446_v13, 0  ;;  %v1613_v47 = vperm.slane %v1607_v30, %v4012_v63  ;;  %v981_v41 = vpack.c.bf16 %v969_v18, %v969_v18  ;;  %v1569_v49 = vsel %vm579_vm5, %v4460_v42, %v1568_v9 }
 0x3ee   : > { %v4610_v24 = vsel %vm579_vm5, %v4602_v19, %v976_v59  ;;  %v1617_v28 = vperm.slane %v1609_v57, %v4012_v63  ;;  %v1621_v44 = vsel %vm579_vm5, %v1581_v32, %v1620_v39  ;;  %v1583_v1 = vsel %vm579_vm5, %v1582_v20, %v1567_v21 }
 0x3ef   : > { %v1595_v29 = vsel %vm579_vm5, %v1594_v23, %v1569_v49  ;;  %v1629_v55 = vperm.slane %v1621_v44, %v4012_v63  ;;  %3017 = vmatmul.msk.bf16.vlgmr.msrb.gmra.mxu2 %vm1708_vm7, %v980_v38  ;;  %v1589_v61 = vperm.slane %v1583_v1, %v4012_v63  ;;  %v1596_v11 = vrot.slane %v1569_v49, 4 }
 0x3f0   : > { %v1601_v45 = vperm.slane %v1595_v29, %v4012_v63  ;;  %3018 = vmatmul.msk.bf16.vlgmr.msrb.gmra.mxu3 %vm1708_vm7, %v981_v41  ;;  %1836 = vmatpush.bf16.xpose.msrb.mxu2 %v1827_v60  ;;  %v1619_v42 = vsel %vm579_vm5, %v1618_v56, %v1577_v36  ;;  %v1656_v5 = vrot.slane %v1613_v47, 4  ;;  %v1585_v16 = vsel %vm579_vm5, %v1571_v33, %v1584_v14 }
 0x3f1   : > { %v1625_v22 = vperm.slane %v1619_v42, %v4012_v63  ;;  %v1632_v17 = vrot.slane %v1589_v61, 4  ;;  %v1593_v8 = vperm.slane %v1585_v16, %v4012_v63  ;;  %v1597_v7 = vsel %vm579_vm5, %v1573_v4, %v1596_v11 }
 0x3f2   : > { %v1630_v54 = vrot.slane %v1601_v45, 4  ;;  %v1666_v46 = vrot.slane %v1629_v55, 4  ;;  %v1668_v58 = vrot.slane %v1617_v28, 4  ;;  %v1605_v2 = vperm.slane %v1597_v7, %v4012_v63 }
 0x3f3   : > { %v1633_v15 = vsel %vm579_vm5, %v1601_v45, %v1632_v17  ;;  %v1657_v34 = vsel %vm579_vm5, %v1625_v22, %v1656_v5  ;;  %v1654_v48 = vrot.slane %v1625_v22, 4  ;;  %v1644_v51 = vrot.slane %v1593_v8, 4 }
 0x3f4   : > { %v1631_v0 = vsel %vm579_vm5, %v1630_v54, %v1589_v61  ;;  %v1641_v26 = vperm.slane %v1633_v15, %v4069_v62  ;;  %v1665_v40 = vperm.slane %v1657_v34, %v4069_v62  ;;  %v1667_v53 = vsel %vm579_vm5, %v1666_v46, %v1617_v28 }
 0x3f5   : > { %v1637_v6 = vperm.slane %v1631_v0, %v4069_v62  ;;  %v1655_v59 = vsel %vm579_vm5, %v1654_v48, %v1613_v47  ;;  %v974_v33 = vrot.slane %v4602_v19, 4  ;;  %v1642_v13 = vrot.slane %v1605_v2, 4 }
 0x3f6   : > { %v1682_v27 = vrot.slane %v1665_v40, 4  ;;  %v1661_v52 = vperm.slane %v1655_v59, %v4069_v62  ;;  %v1684_v37 = vrot.slane %v1641_v26, 4  ;;  %v1673_v21 = vperm.slane %v1667_v53, %v4069_v62 }
 0x3f7   : > { %v1680_v12 = vrot.slane %v1637_v6, 4  ;;  %v1645_v4 = vsel %vm579_vm5, %v1605_v2, %v1644_v51  ;;  %v1669_v25 = vsel %vm579_vm5, %v1629_v55, %v1668_v58  ;;  %v1643_v31 = vsel %vm579_vm5, %v1642_v13, %v1593_v8 }
 0x3f8   : > { %v1683_v20 = vsel %vm579_vm5, %v1682_v27, %v1641_v26  ;;  %v1678_v9 = vrot.slane %v1661_v52, 4  ;;  %v1685_v50 = vsel %vm579_vm5, %v1665_v40, %v1684_v37  ;;  %v1649_v36 = vperm.slane %v1643_v31, %v4069_v62 }
 0x3f9   : > { %v1681_v32 = vsel %vm579_vm5, %v1661_v52, %v1680_v12  ;;  %v1696_v14 = vpack.c.bf16 %v1683_v20, %v1683_v20  ;;  %v1697_v23 = vpack.c.bf16 %v1685_v50, %v1685_v50  ;;  %v1686_v38 = vrot.slane %v1673_v21, 4 }
 0x3fa   : > { %v1695_v3 = vpack.c.bf16 %v1681_v32, %v1681_v32  ;;  %v1679_v56 = vsel %vm579_vm5, %v1678_v9, %v1637_v6  ;;  %v1653_v18 = vperm.slane %v1645_v4, %v4069_v62  ;;  %v1677_v39 = vperm.slane %v1669_v25, %v4069_v62 }
 0x3fb   : > { %v1694_v19 = vpack.c.bf16 %v1679_v56, %v1679_v56  ;;  %v2003_v30 = vsel %vm1944_vm8, %v1697_v23, 0  ;;  %v1687_v60 = vsel %vm579_vm5, %v1686_v38, %v1649_v36  ;;  %v1688_v41 = vrot.slane %v1649_v36, 4 }
 0x3fc   : > { %v1965_v57 = vsel %vm1944_vm8, %v1695_v3, 0  ;;  %2012 = vmatpush.bf16.msrb.mxu3 %v2003_v30  ;;  %v1692_v47 = vrot.slane %v1653_v18, 4  ;;  %v975_v49 = vsel %vm579_vm5, %v974_v33, %v4450_v10  ;;  %v982_v28 = vpack.c.bf16 %v4561_v43, %v4561_v43 }
 0x3fd   : > { %1974 = vmatpush.bf16.msra.mxu1 %v1965_v57  ;;  %v1984_v44 = vsel %vm1944_vm8, %v1696_v14, 0  ;;  %v1946_v1 = vsel %vm1944_vm8, %v1694_v19, 0  ;;  %v1698_v29 = vpack.c.bf16 %v1687_v60, %v1687_v60  ;;  %v985_v55 = vpack.c.bf16 %v4610_v24, %v4610_v24 }
 0x3fe   : > { %1955 = vmatpush.bf16.msrb.mxu0 %v1946_v1  ;;  %v1693_v61 = vsel %vm579_vm5, %v1677_v39, %v1692_v47  ;;  %v1689_v11 = vsel %vm579_vm5, %v1673_v21, %v1688_v41  ;;  %v1690_v24 = vrot.slane %v1677_v39, 4  ;;  %v984_v17 = vpack.c.bf16 %v975_v49, %v975_v49 }
 0x3ff   : > { %3019 = vmatmul.msk.bf16.vlgmr.msra.gmra.mxu2 %vm1708_vm7, %v982_v28  ;;  %v2022_v10 = vsel %vm1944_vm8, %v1698_v29, 0  ;;  %v1701_v45 = vpack.c.bf16 %v1693_v61, %v1693_v61  ;;  %v1699_v42 = vpack.c.bf16 %v1689_v11, %v1689_v11  ;;  %v1702_v8 = vlaneseq }
 0x400   : > { %3022 = vmatmul.msk.bf16.vlgmr.msra.gmra.mxu3 %vm1708_vm7, %v985_v55  ;;  %1993 = vmatpush.bf16.msra.mxu2 %v1984_v44  ;;  %v1691_v16 = vsel %vm579_vm5, %v1690_v24, %v1653_v18  ;;  %v3698_v58 = vmov -1e+30  }
 0x401   : > { %v2079_v43 = vsel %vm1944_vm8, %v1701_v45, 0  ;;  %v2041_v5 = vsel %vm1944_vm8, %v1699_v42, 0  ;;  %v1700_v22 = vpack.c.bf16 %v1691_v16, %v1691_v16  ;;  %v1703_v7 = vshrl.u32 %v1702_v8, 7 }
 0x402   : > { %2031 = vmatpush.bf16.msra.mxu0 %v2022_v10  ;;  %2088 = vmatpush.bf16.msra.mxu3 %v2079_v43  ;;  %v1705_v46 = vand.u32 127, %v1702_v8 }
 0x403   : > { %2050 = vmatpush.bf16.msrb.mxu1 %v2041_v5  ;;  %v2060_v54 = vsel %vm1944_vm8, %v1700_v22, 0 }
 0x404   : > { %vm1706_vm9 = vcmp.le.s32.totalorder %v1705_v46, %v1703_v7 }
 0x405   : > { %v1707_v15 = vsel %vm1706_vm9, 0.0, %v3698_v58 }
 0x40f   : > { %3021 = vmatmul.msk.bf16.vlgmr.msrb.gmra.mxu2 %vm1708_vm7, %v984_v17 }
 0x410   : > { %2069 = vmatpush.bf16.msrb.mxu2 %v2060_v54 }
 0x462   : > { %v1724_v34 = vpop.f32.mrf.mxu2 }
 0x463   : > { %v1725_v48 = vadd.f32 %v1724_v34, %v1707_v15  ;;  %v1743_v26 = vpop.f32.mrf.mxu3 }
 0x464   : > { %v1819_v0 = vpop.f32.mrf.mxu1  ;;  %v1744_v37 = vadd.f32 %v1743_v26, %v1707_v15 }
 0x465   : > { %v1861_v40 = vsel %vm1708_vm7, %v1725_v48, -inf  ;;  %v4678_v38 = vadd.f32 %v1819_v0, %v1707_v15 }
 0x466   : > { %1862 = vmax.xlane.f32.xlu0 %v1861_v40  ;;  %v1864_v4 = vsel %vm1708_vm7, %v1744_v37, -inf }
 0x467   : > { %v1876_v19 = vsel %vm1708_vm7, %v4678_v38, -inf }
 0x46a   : > { %v1726_v6 = vpop.f32.mrf.mxu2 }
 0x46b   : > { %v1745_v59 = vpop.f32.mrf.mxu3 }
 0x46c   : > { %v1821_v2 = vpop.f32.mrf.mxu1 }
 0x472   : > { %v1762_v53 = vpop.f32.mrf.mxu2 }
 0x473   : > { %v1763_v51 = vadd.f32 %v1762_v53, %v1707_v15  ;;  %v1781_v33 = vpop.f32.mrf.mxu3 }
 0x474   : > { %v1782_v27 = vadd.f32 %v1781_v33, %v1707_v15 }
 0x475   : > { %v1867_v52 = vsel %vm1708_vm7, %v1763_v51, -inf }
 0x476   : > { %v1870_v12 = vsel %vm1708_vm7, %v1782_v27, -inf  ;;  %1868 = vmax.xlane.f32.xlu1 %v1867_v52 }
 0x477   : > { %1871 = vmax.xlane.f32.xlu2 %v1870_v12 }
 0x47a   : > { %v1764_v13 = vpop.f32.mrf.mxu2 }
 0x47b   : > { %v1783_v21 = vpop.f32.mrf.mxu3 }
 0x47f   : > { %1865 = vmax.xlane.f32.xlu2 %v1864_v4 }
 0x482   : > { %v1800_v25 = vpop.f32.mrf.mxu2 }
 0x483   : > { %v1801_v20 = vadd.f32 %v1800_v25, %v1707_v15  ;;  %v1857_v9 = vpop.f32.mrf.mxu3 }
 0x484   : > { %v1858_v50 = vadd.f32 %v1857_v9, %v1707_v15 }
 0x485   : > { %v1873_v32 = vsel %vm1708_vm7, %v1801_v20, -inf }
 0x486   : > { %v1882_v14 = vsel %vm1708_vm7, %v1858_v50, -inf }
 0x487   : > { %1874 = vmax.xlane.f32.xlu2 %v1873_v32  ;;  %1883 = vmax.xlane.f32.xlu0 %v1882_v14 }
 0x48a   : > { %v1802_v23 = vpop.f32.mrf.mxu2 }
 0x48b   : > { %v1859_v3 = vpop.f32.mrf.mxu3 }
 0x492   : > { %v1838_v31 = vpop.f32.mrf.mxu2 }
 0x493   : > { %v1839_v56 = vadd.f32 %v1838_v31, %v1707_v15 }
 0x495   : > { %v1879_v36 = vsel %vm1708_vm7, %v1839_v56, -inf }
 0x496   : > { %1880 = vmax.xlane.f32.xlu1 %v1879_v36 }
 0x49a   : > { %v1840_v18 = vpop.f32.mrf.mxu2 }
 0x49e   : > { %1877 = vmax.xlane.f32.xlu1 %v1876_v19 }
 0x4d9   : > { %v1863_v30 = vpop.xlane.xlu0 %1862 }
 0x4da   : > { %v1885_v57 = vsub.f32 %v1725_v48, %v1863_v30 }
 0x4dc   : > { %v1893_v39 = vmul.f32 1.442695, %v1885_v57 }
 0x4de   : > { %3437 = vpow2.f32 %v1893_v39 }
 0x4e4   : > { %v3438_v60 = vpop.eup %3437 }
 0x4e5   : > { %v1909_v47 = vsel %vm1708_vm7, %v3438_v60, 0.0  ;;  %v1933_v41 = vpack.c.bf16 %v3438_v60, %v3438_v60 }
 0x4e6   : > { %1910 = vadd.xlane.f32.xlu1 %v1909_v47 }
 0x4e7   : > { %3023 = vmatmul.msk.bf16.vlgmr.msrb.gmra.mxu0 %vm1708_vm7, %v1933_v41 }
 0x4e9   : > { %v1869_v49 = vpop.xlane.xlu1 %1868 }
 0x4ea   : > { %v1872_v28 = vpop.xlane.xlu2 %1871  ;;  %v1887_v44 = vsub.f32 %v1763_v51, %v1869_v49 }
 0x4eb   : > { %v1888_v1 = vsub.f32 %v1782_v27, %v1872_v28 }
 0x4ec   : > { %v1897_v29 = vmul.f32 1.442695, %v1887_v44 }
 0x4ed   : > { %v1899_v55 = vmul.f32 1.442695, %v1888_v1 }
 0x4ee   : > { %3439 = vpow2.f32 %v1897_v29 }
 0x4ef   : > { %3441 = vpow2.f32 %v1899_v55 }
 0x4f2   : > { %v1866_v61 = vpop.xlane.xlu2 %1865 }
 0x4f3   : > { %v1886_v11 = vsub.f32 %v1744_v37, %v1866_v61 }
 0x4f4   : > { %v3440_v10 = vpop.eup %3439 }
 0x4f5   : > { %v3442_v45 = vpop.eup %3441  ;;  %v1935_v42 = vpack.c.bf16 %v3440_v10, %v3440_v10  ;;  %v1895_v43 = vmul.f32 1.442695, %v1886_v11  ;;  %v1915_v5 = vsel %vm1708_vm7, %v3440_v10, 0.0 }
 0x4f6   : > { %v1936_v24 = vpack.c.bf16 %v3442_v45, %v3442_v45  ;;  %1916 = vadd.xlane.f32.xlu0 %v1915_v5  ;;  %v1918_v58 = vsel %vm1708_vm7, %v3442_v45, 0.0 }
 0x4f7   : > { %3443 = vpow2.f32 %v1895_v43  ;;  %3025 = vmatmul.msk.bf16.vlgmr.msra.gmra.mxu2 %vm1708_vm7, %v1935_v42 }
 0x4f8   : > { %3026 = vmatmul.msk.bf16.vlgmr.msrb.gmra.mxu3 %vm1708_vm7, %v1936_v24 }
 0x4fa   : > { %v1875_v16 = vpop.xlane.xlu2 %1874  ;;  %v1884_v22 = vpop.xlane.xlu0 %1883 }
 0x4fb   : > { %v1889_v17 = vsub.f32 %v1801_v20, %v1875_v16  ;;  %v1892_v54 = vsub.f32 %v1858_v50, %v1884_v22 }
 0x4fd   : > { %v3444_v8 = vpop.eup %3443  ;;  %v1901_v7 = vmul.f32 1.442695, %v1889_v17  ;;  %v1907_v46 = vmul.f32 1.442695, %v1892_v54 }
 0x4fe   : > { %v1934_v15 = vpack.c.bf16 %v3444_v8, %v3444_v8  ;;  %1919 = vadd.xlane.f32.xlu0 %v1918_v58  ;;  %v1912_v34 = vsel %vm1708_vm7, %v3444_v8, 0.0 }
 0x4ff   : > { %3445 = vpow2.f32 %v1901_v7  ;;  %1913 = vadd.xlane.f32.xlu1 %v1912_v34 }
 0x500   : > { %3447 = vpow2.f32 %v1907_v46  ;;  %3024 = vmatmul.msk.bf16.vlgmr.msra.gmra.mxu1 %vm1708_vm7, %v1934_v15 }
 0x505   : > { %v3446_v0 = vpop.eup %3445 }
 0x506   : > { %v3448_v48 = vpop.eup %3447  ;;  %v1937_v26 = vpack.c.bf16 %v3446_v0, %v3446_v0  ;;  %v1921_v40 = vsel %vm1708_vm7, %v3446_v0, 0.0 }
 0x507   : > { %v1940_v6 = vpack.c.bf16 %v3448_v48, %v3448_v48  ;;  %1922 = vadd.xlane.f32.xlu2 %v1921_v40  ;;  %v1930_v25 = vsel %vm1708_vm7, %v3448_v48, 0.0 }
 0x508   : > { %3027 = vmatmul.msk.bf16.vlgmr.msra.gmra.mxu0 %vm1708_vm7, %v1937_v26 }
 0x509   : > { %3030 = vmatmul.msk.bf16.vlgmr.msra.gmra.mxu3 %vm1708_vm7, %v1940_v6  ;;  %v1881_v2 = vpop.xlane.xlu1 %1880 }
 0x50a   : > { %v1891_v59 = vsub.f32 %v1839_v56, %v1881_v2 }
 0x50c   : > { %v1905_v53 = vmul.f32 1.442695, %v1891_v59 }
 0x50e   : > { %3449 = vpow2.f32 %v1905_v53 }
 0x511   : > { %v1878_v51 = vpop.xlane.xlu1 %1877 }
 0x512   : > { %v1890_v33 = vsub.f32 %v4678_v38, %v1878_v51 }
 0x514   : > { %v3450_v27 = vpop.eup %3449  ;;  %v1903_v52 = vmul.f32 1.442695, %v1890_v33 }
 0x515   : > { %v1939_v12 = vpack.c.bf16 %v3450_v27, %v3450_v27  ;;  %v1927_v37 = vsel %vm1708_vm7, %v3450_v27, 0.0 }
 0x516   : > { %3451 = vpow2.f32 %v1903_v52  ;;  %1928 = vadd.xlane.f32.xlu2 %v1927_v37 }
 0x517   : > { %3029 = vmatmul.msk.bf16.vlgmr.msrb.gmra.mxu2 %vm1708_vm7, %v1939_v12 }
 0x51c   : > { %v3452_v13 = vpop.eup %3451 }
 0x51d   : > { %v1938_v21 = vpack.c.bf16 %v3452_v13, %v3452_v13  ;;  %v1924_v4 = vsel %vm1708_vm7, %v3452_v13, 0.0 }
 0x51e   : > { %1925 = vadd.xlane.f32.xlu0 %v1924_v4  ;;  %1931 = vadd.xlane.f32.xlu2 %v1930_v25 }
 0x51f   : > { %3028 = vmatmul.msk.bf16.vlgmr.msrb.gmra.mxu1 %vm1708_vm7, %v1938_v21 }
 0x559   : > { %v1911_v9 = vpop.xlane.xlu1 %1910 }
 0x55a   : > { %3453 = vrcp.f32 %v1911_v9  ;;  %v2105_v55 = vand.u32 2147483648, %v1911_v9  ;;  %vm2099_vm11 = vweird.f32 %v1911_v9  ;;  %v2103_v16 = vand.u32 2147483647, %v1911_v9 }
 0x55c   : > { %v2106_v22 = vor.u32 1.1754944e-38, %v2105_v55  ;;  %vm2104_vm4 = vcmp.eq.f32.partialorder %v2103_v16, 8.507059e+37 }
 0x560   : > { %v3454_v14 = vpop.eup %3453 }
 0x561   : > { %v2095_v31 = vmul.f32 %v3454_v14, %v1911_v9  ;;  %vm2100_vm10 = vweird.f32 %v3454_v14 }
 0x562   : > { %vm4734_vm12 = vmor %vm2099_vm11, %vm2100_vm10 }
 0x563   : > { %v2096_v38 = vsub.f32 1.0, %v2095_v31 }
 0x564   : > { %v4699_v20 = vpop.f32.mrf.mxu0 }
 0x565   : > { %v2097_v41 = vmul.f32 %v3454_v14, %v2096_v38 }
 0x567   : > { %v2098_v29 = vadd.f32 %v3454_v14, %v2097_v41 }
 0x569   : > { %v4701_v50 = vpop.xlane.xlu0 %1916  ;;  %v2102_v24 = vsel %vm4734_vm12, %v3454_v14, %v2098_v29 }
 0x56a   : > { %3455 = vrcp.f32 %v4701_v50  ;;  %vm2127_vm14 = vweird.f32 %v4701_v50  ;;  %v2133_v54 = vand.u32 2147483648, %v4701_v50  ;;  %v2131_v0 = vand.u32 2147483647, %v4701_v50 }
 0x56b   : > { %v2107_v59 = vsel %vm2104_vm4, %v2106_v22, %v2102_v24 }
 0x56c   : > { %v1959_v32 = vpop.f32.mrf.mxu0  ;;  %v2134_v51 = vor.u32 1.1754944e-38, %v2133_v54  ;;  %vm2132_vm10 = vcmp.eq.f32.partialorder %v2131_v0, 8.507059e+37  ;;  %v2206_v9 = vmul.f32 %v2107_v59, %v4699_v20 }
 0x56e   : > { %v2216_v38 = vrot.slane %v2206_v9, 4 }
 0x570   : > { %v4710_v56 = vpop.eup %3455 }
 0x571   : > { %v4704_v23 = vpop.xlane.xlu0 %1919  ;;  %v2123_v19 = vmul.f32 %v4710_v56, %v4701_v50  ;;  %vm2128_vm13 = vweird.f32 %v4710_v56 }
 0x572   : > { %v4706_v3 = vpop.xlane.xlu1 %1913  ;;  %3457 = vrcp.f32 %v4704_v23  ;;  %vm4752_vm2 = vmor %vm2127_vm14, %vm2128_vm13  ;;  %vm2141_vm3 = vweird.f32 %v4704_v23  ;;  %v2147_v48 = vand.u32 2147483648, %v4704_v23  ;;  %v2145_v6 = vand.u32 2147483647, %v4704_v23 }
 0x573   : > { %3459 = vrcp.f32 %v4706_v3  ;;  %v2124_v49 = vsub.f32 1.0, %v2123_v19  ;;  %v2119_v26 = vand.u32 2147483648, %v4706_v3  ;;  %vm2113_vm8 = vweird.f32 %v4706_v3 }
 0x574   : > { %v2117_v2 = vand.u32 2147483647, %v4706_v3  ;;  %v2148_v13 = vor.u32 1.1754944e-38, %v2147_v48  ;;  %vm2146_vm11 = vcmp.eq.f32.partialorder %v2145_v6, 8.507059e+37 }
 0x575   : > { %v2125_v61 = vmul.f32 %v4710_v56, %v2124_v49  ;;  %v2120_v21 = vor.u32 1.1754944e-38, %v2119_v26 }
 0x576   : > { %vm2118_vm12 = vcmp.eq.f32.partialorder %v2117_v2, 8.507059e+37 }
 0x577   : > { %v2126_v17 = vadd.f32 %v4710_v56, %v2125_v61 }
 0x578   : > { %v4712_v36 = vpop.eup %3457 }
 0x579   : > { %v4714_v18 = vpop.eup %3459  ;;  %v2137_v57 = vmul.f32 %v4712_v36, %v4704_v23  ;;  %vm2142_vm15 = vweird.f32 %v4712_v36  ;;  %v2130_v53 = vsel %vm4752_vm2, %v4710_v56, %v2126_v17 }
 0x57a   : > { %v2109_v30 = vmul.f32 %v4714_v18, %v4706_v3  ;;  %v4722_v39 = vpop.xlane.xlu2 %1922  ;;  %v4724_v60 = vpop.f32.mrf.mxu2  ;;  %vm2114_vm1 = vweird.f32 %v4714_v18  ;;  %vm4760_vm6 = vmor %vm2141_vm3, %vm2142_vm15  ;;  %v2135_v4 = vsel %vm2132_vm10, %v2134_v51, %v2130_v53 }
 0x57b   : > { %v4726_v47 = vpop.f32.mrf.mxu3  ;;  %3461 = vrcp.f32 %v4722_v39  ;;  %v2138_v1 = vsub.f32 1.0, %v2137_v57  ;;  %vm4770_vm9 = vmor %vm2113_vm8, %vm2114_vm1  ;;  %v2208_v3 = vmul.f32 %v2135_v4, %v4724_v60  ;;  %vm2155_vm13 = vweird.f32 %v4722_v39 }
 0x57c   : > { %v2110_v44 = vsub.f32 1.0, %v2109_v30  ;;  %v2161_v57 = vand.u32 2147483648, %v4722_v39 }
 0x57d   : > { %v1976_v28 = vpop.f32.mrf.mxu1  ;;  %v2139_v11 = vmul.f32 %v4712_v36, %v2138_v1  ;;  %v2214_v60 = vrot.slane %v2208_v3, 4 }
 0x57e   : > { %v2111_v10 = vmul.f32 %v4714_v18, %v2110_v44  ;;  %v2159_v44 = vand.u32 2147483647, %v4722_v39 }
 0x57f   : > { %v2140_v58 = vadd.f32 %v4712_v36, %v2139_v11  ;;  %v2215_v43 = vsel %vm579_vm5, %v2214_v60, %v2206_v9 }
 0x580   : > { %v2112_v15 = vadd.f32 %v4714_v18, %v2111_v10  ;;  %vm2160_vm3 = vcmp.eq.f32.partialorder %v2159_v44, 8.507059e+37 }
 0x581   : > { %v4732_v42 = vpop.eup %3461  ;;  %v2144_v12 = vsel %vm4760_vm6, %v4712_v36, %v2140_v58 }
 0x582   : > { %v1997_v45 = vpop.f32.mrf.mxu2  ;;  %v2151_v46 = vmul.f32 %v4732_v42, %v4722_v39  ;;  %v2116_v37 = vsel %vm4770_vm9, %v4714_v18, %v2112_v15  ;;  %v2149_v50 = vsel %vm2146_vm11, %v2148_v13, %v2144_v12  ;;  %vm2156_vm14 = vweird.f32 %v4732_v42 }
 0x583   : > { %v2016_v5 = vpop.f32.mrf.mxu3  ;;  %v2121_v32 = vsel %vm2118_vm12, %v2120_v21, %v2116_v37  ;;  %v2209_v56 = vmul.f32 %v2149_v50, %v4726_v47  ;;  %v2217_v47 = vsel %vm579_vm5, %v2208_v3, %v2216_v38  ;;  %vm4800_vm15 = vmor %vm2155_vm13, %vm2156_vm14 }
 0x584   : > { %v2152_v52 = vsub.f32 1.0, %v2151_v46  ;;  %v2207_v36 = vmul.f32 %v2121_v32, %v1976_v28  ;;  %v4805_v10 = vperm.slane %v2217_v47, %v4012_v63  ;;  %v2162_v5 = vor.u32 1.1754944e-38, %v2161_v57 }
 0x585   : > { %v1978_v8 = vpop.f32.mrf.mxu1  ;;  %v4745_v7 = vpop.f32.mrf.mxu0  ;;  %v2226_v49 = vrot.slane %v2209_v56, 4 }
 0x586   : > { %v2153_v23 = vmul.f32 %v4732_v42, %v2152_v52  ;;  %v2228_v28 = vrot.slane %v2207_v36, 4  ;;  %v2276_v15 = vrot.slane %v4805_v10, 4 }
 0x587   : > { %v2227_v16 = vsel %vm579_vm5, %v2226_v49, %v2207_v36 }
 0x588   : > { %v2154_v20 = vadd.f32 %v4732_v42, %v2153_v23  ;;  %v2229_v22 = vsel %vm579_vm5, %v2209_v56, %v2228_v28  ;;  %v2233_v26 = vperm.slane %v2227_v16, %v4012_v63 }
 0x589   : > { %v1929_v27 = vpop.xlane.xlu2 %1928  ;;  %v2237_v40 = vperm.slane %v2229_v22, %v4012_v63 }
 0x58a   : > { %3463 = vrcp.f32 %v1929_v27  ;;  %v2189_v29 = vand.u32 2147483648, %v1929_v27  ;;  %v2187_v11 = vand.u32 2147483647, %v1929_v27  ;;  %v2158_v45 = vsel %vm4800_vm15, %v4732_v42, %v2154_v20 }
 0x58b   : > { %vm2183_vm2 = vweird.f32 %v1929_v27  ;;  %v2163_v8 = vsel %vm2160_vm3, %v2162_v5, %v2158_v45  ;;  %v2221_v42 = vperm.slane %v2215_v43, %v4012_v63  ;;  %v2262_v9 = vrot.slane %v2233_v26, 4 }
 0x58c   : > { %v4780_v25 = vpop.f32.mrf.mxu3  ;;  %v2190_v17 = vor.u32 1.1754944e-38, %v2189_v29  ;;  %vm2188_vm6 = vcmp.eq.f32.partialorder %v2187_v11, 8.507059e+37  ;;  %v2210_v59 = vmul.f32 %v2163_v8, %v4745_v7  ;;  %v2274_v50 = vrot.slane %v2237_v40, 4 }
 0x58d   : > { %v2035_v14 = vpop.f32.mrf.mxu0  ;;  %v2264_v13 = vrot.slane %v2221_v42, 4  ;;  %v2263_v47 = vsel %vm579_vm5, %v2262_v9, %v2221_v42  ;;  %vm2471_vm3 = vcmask 261120  }
 0x58e   : > { %v2240_v7 = vrot.slane %v2210_v59, 4  ;;  %v2275_v44 = vsel %vm579_vm5, %v2274_v50, %v4805_v10  ;;  %v2269_v11 = vperm.slane %v2263_v47, %v4069_v62 }
 0x58f   : > { %v2281_v43 = vperm.slane %v2275_v44, %v4069_v62 }
 0x590   : > { %v3464_v31 = vpop.eup %3463 }
 0x591   : > { %v2179_v18 = vmul.f32 %v3464_v31, %v1929_v27  ;;  %v4787_v19 = vpop.xlane.xlu2 %1931  ;;  %v4789_v30 = vpop.xlane.xlu0 %1925  ;;  %vm2184_vm1 = vweird.f32 %v3464_v31 }
 0x592   : > { %3465 = vrcp.f32 %v4787_v19  ;;  %vm2185_vm4 = vmor %vm2183_vm2, %vm2184_vm1  ;;  %v2201_v53 = vand.u32 2147483647, %v4787_v19  ;;  %v2203_v51 = vand.u32 2147483648, %v4787_v19  ;;  %v2175_v37 = vand.u32 2147483648, %v4789_v30 }
 0x593   : > { %v2180_v41 = vsub.f32 1.0, %v2179_v18  ;;  %3467 = vrcp.f32 %v4789_v30  ;;  %v2173_v4 = vand.u32 2147483647, %v4789_v30  ;;  %vm2197_vm10 = vweird.f32 %v4787_v19 }
 0x594   : > { %v2092_v1 = vpop.f32.mrf.mxu3  ;;  %v2204_v14 = vor.u32 1.1754944e-38, %v2203_v51  ;;  %vm2169_vm12 = vweird.f32 %v4789_v30  ;;  %vm2202_vm13 = vcmp.eq.f32.partialorder %v2201_v53, 8.507059e+37  ;;  %v2176_v56 = vor.u32 1.1754944e-38, %v2175_v37 }
 0x595   : > { %v2181_v61 = vmul.f32 %v3464_v31, %v2180_v41  ;;  %vm2174_vm15 = vcmp.eq.f32.partialorder %v2173_v4, 8.507059e+37  ;;  %vm2467_vm1 = vcmask 130048   ;;  %vm2469_vm2 = vcmask 195584  }
 0x597   : > { %v2182_v24 = vadd.f32 %v3464_v31, %v2181_v61 }
 0x598   : > { %v3466_v39 = vpop.eup %3465 }
 0x599   : > { %v3468_v54 = vpop.eup %3467  ;;  %v2193_v46 = vmul.f32 %v3466_v39, %v4787_v19  ;;  %v2186_v58 = vsel %vm2185_vm4, %v3464_v31, %v2182_v24  ;;  %vm2198_vm8 = vweird.f32 %v3466_v39  ;;  %v2265_v19 = vsel %vm579_vm5, %v2233_v26, %v2264_v13 }
 0x59a   : > { %v2165_v34 = vmul.f32 %v3468_v54, %v4789_v30  ;;  %v2071_v0 = vpop.f32.mrf.mxu2  ;;  %v2191_v48 = vsel %vm2188_vm6, %v2190_v17, %v2186_v58  ;;  %vm2170_vm9 = vweird.f32 %v3468_v54  ;;  %vm2199_vm11 = vmor %vm2197_vm10, %vm2198_vm8  ;;  %v2277_v30 = vsel %vm579_vm5, %v2237_v40, %v2276_v15 }
 0x59b   : > { %v2194_v6 = vsub.f32 1.0, %v2193_v46  ;;  %v2212_v2 = vmul.f32 %v2191_v48, %v2071_v0  ;;  %vm2171_vm14 = vmor %vm2169_vm12, %vm2170_vm9  ;;  %v2273_v55 = vperm.slane %v2265_v19, %v4069_v62  ;;  %v2312_v15 = vrot.slane %v2269_v11, 4 }
 0x59c   : > { %v2166_v33 = vsub.f32 1.0, %v2165_v34  ;;  %v2052_v27 = vpop.f32.mrf.mxu1  ;;  %v2320_v34 = vrot.slane %v2281_v43, 4  ;;  %vm2475_vm4 = vcmask 392192   ;;  %vm2477_vm6 = vcmask 457728  }
 0x59d   : > { %v2195_v52 = vmul.f32 %v3466_v39, %v2194_v6  ;;  %v2238_v12 = vrot.slane %v2212_v2, 4  ;;  %v2241_v38 = vsel %vm579_vm5, %v2212_v2, %v2240_v7  ;;  %v2316_v22 = vrot.slane %v2273_v55, 4 }
 0x59e   : > { %v2167_v21 = vmul.f32 %v3468_v54, %v2166_v33  ;;  %v2249_v1 = vperm.slane %v2241_v38, %v4012_v63 }
 0x59f   : > { %v2196_v32 = vadd.f32 %v3466_v39, %v2195_v52  ;;  %v2239_v31 = vsel %vm579_vm5, %v2238_v12, %v2210_v59 }
 0x5a0   : > { %v2168_v23 = vadd.f32 %v3468_v54, %v2167_v21  ;;  %v2245_v41 = vperm.slane %v2239_v31, %v4012_v63  ;;  %v2300_v10 = vrot.slane %v2249_v1, 4 }
 0x5a1   : > { %v2200_v3 = vsel %vm2199_vm11, %v3466_v39, %v2196_v32 }
 0x5a2   : > { %v2205_v36 = vsel %vm2202_vm13, %v2204_v14, %v2200_v3  ;;  %v2172_v18 = vsel %vm2171_vm14, %v3468_v54, %v2168_v23  ;;  %v2073_v20 = vpop.f32.mrf.mxu2  ;;  %v2288_v5 = vrot.slane %v2245_v41, 4 }
 0x5a3   : > { %v2177_v57 = vsel %vm2174_vm15, %v2176_v56, %v2172_v18  ;;  %v2213_v60 = vmul.f32 %v2205_v36, %v4780_v25  ;;  %v2285_v25 = vperm.slane %v2277_v30, %v4069_v62 }
 0x5a4   : > { %v2211_v49 = vmul.f32 %v2177_v57, %v2052_v27  ;;  %v2054_v28 = vpop.f32.mrf.mxu1 }
 0x5a5   : > { %v2250_v29 = vrot.slane %v2213_v60, 4  ;;  %v2324_v8 = vrot.slane %v2285_v25, 4 }
 0x5a6   : > { %v2252_v61 = vrot.slane %v2211_v49, 4 }
 0x5a7   : > { %v2251_v45 = vsel %vm579_vm5, %v2250_v29, %v2211_v49 }
 0x5a8   : > { %v2253_v24 = vsel %vm579_vm5, %v2213_v60, %v2252_v61  ;;  %v2257_v39 = vperm.slane %v2251_v45, %v4012_v63 }
 0x5a9   : > { %v2261_v16 = vperm.slane %v2253_v24, %v4012_v63 }
 0x5aa   : > { %v2286_v17 = vrot.slane %v2257_v39, 4  ;;  %v2289_v54 = vsel %vm579_vm5, %v2257_v39, %v2288_v5 }
 0x5ab   : > { %v2297_v46 = vperm.slane %v2289_v54, %v4069_v62  ;;  %v2298_v58 = vrot.slane %v2261_v16, 4  ;;  %v2301_v42 = vsel %vm579_vm5, %v2261_v16, %v2300_v10 }
 0x5ac   : > { %v2287_v0 = vsel %vm579_vm5, %v2286_v17, %v2245_v41  ;;  %v2309_v48 = vperm.slane %v2301_v42, %v4069_v62 }
 0x5ad   : > { %v2293_v26 = vperm.slane %v2287_v0, %v4069_v62  ;;  %v2299_v40 = vsel %vm579_vm5, %v2298_v58, %v2249_v1  ;;  %v2314_v6 = vrot.slane %v2297_v46, 4  ;;  %v2317_v2 = vsel %vm579_vm5, %v2297_v46, %v2316_v22 }
 0x5ae   : > { %v2305_v59 = vperm.slane %v2299_v40, %v4069_v62  ;;  %v2322_v53 = vrot.slane %v2309_v48, 4  ;;  %v2325_v51 = vsel %vm579_vm5, %v2309_v48, %v2324_v8  ;;  %v2338_v33 = vrot.slane %v2317_v2, 4 }
 0x5af   : > { %v2310_v27 = vrot.slane %v2293_v26, 4  ;;  %v2313_v52 = vsel %vm579_vm5, %v2293_v26, %v2312_v15  ;;  %v2315_v12 = vsel %vm579_vm5, %v2314_v6, %v2273_v55  ;;  %v2362_v37 = vrot.slane %v2325_v51, 4 }
 0x5b0   : > { %v2318_v13 = vrot.slane %v2305_v59, 4  ;;  %v2326_v21 = vrot.slane %v2315_v12, 4  ;;  %v2340_v4 = vrot.slane %v2313_v52, 4  ;;  %v2321_v9 = vsel %vm579_vm5, %v2305_v59, %v2320_v34 }
 0x5b1   : > { %v2311_v50 = vsel %vm579_vm5, %v2310_v27, %v2269_v11  ;;  %v2323_v32 = vsel %vm579_vm5, %v2322_v53, %v2285_v25  ;;  %v2339_v7 = vsel %vm579_vm5, %v2338_v33, %v2313_v52  ;;  %v2363_v14 = vsel %vm579_vm5, %v2362_v37, %v2321_v9 }
 0x5b2   : > { %v2319_v23 = vsel %vm579_vm5, %v2318_v13, %v2281_v43  ;;  %v2327_v3 = vsel %vm579_vm5, %v2326_v21, %v2311_v50  ;;  %v2345_v31 = vperm.slane %v2339_v7, %v4012_v63  ;;  %v2350_v56 = vrot.slane %v2323_v32, 4  ;;  %v3162_v7 = vld [vmem:[#allocation5 + $0x10] sm:$0xff] }
 0x5b3   : > { %v2333_v36 = vperm.slane %v2327_v3, %v4012_v63  ;;  %v2352_v38 = vrot.slane %v2319_v23, 4  ;;  %v2364_v18 = vrot.slane %v2321_v9, 4  ;;  %v2369_v20 = vperm.slane %v2363_v14, %v4012_v63  ;;  %v3161_v14 = vld [vmem:[#allocation5 + $0x8] sm:$0xff] }
 0x5b4   : > { %v2351_v19 = vsel %vm579_vm5, %v2350_v56, %v2319_v23  ;;  %v2374_v57 = vrot.slane %v2345_v31, 4  ;;  %v2328_v60 = vrot.slane %v2311_v50, 4  ;;  %v2341_v47 = vsel %vm579_vm5, %v2317_v2, %v2340_v4 }
 0x5b5   : > { %v2357_v30 = vperm.slane %v2351_v19, %v4012_v63  ;;  %v2398_v41 = vrot.slane %v2369_v20, 4  ;;  %v2349_v49 = vperm.slane %v2341_v47, %v4012_v63  ;;  %v2353_v28 = vsel %vm579_vm5, %v2323_v32, %v2352_v38  ;;  %v3163_v32 = vld [vmem:[#allocation5 + $0x18] sm:$0xff] }
 0x5b6   : > { %v2375_v44 = vsel %vm579_vm5, %v2374_v57, %v2333_v36  ;;  %v2329_v1 = vsel %vm579_vm5, %v2315_v12, %v2328_v60  ;;  %v2361_v29 = vperm.slane %v2353_v28, %v4012_v63  ;;  %v2365_v55 = vsel %vm579_vm5, %v2325_v51, %v2364_v18  ;;  %2519 = vmatpush.bf16.msrb.mxu0 %v3163_v32 }
 0x5b7   : > { %v2381_v61 = vperm.slane %v2375_v44, %v4069_v62  ;;  %v2399_v11 = vsel %vm579_vm5, %v2398_v41, %v2357_v30  ;;  %v2337_v25 = vperm.slane %v2329_v1, %v4012_v63  ;;  %v2373_v45 = vperm.slane %v2365_v55, %v4012_v63  ;;  %v3479_v44 = vld [vmem:[%s3868_s7] sm:$0xff]  ;;  %s2867_s7 = sshll.u32 %s2863_s18, 4  ;;  %s2868_s7 = int_to_ptr.hbm [resolvable:$true] %s2867_s7 }
 0x5b8   : > { %v2405_v43 = vperm.slane %v2399_v11, %v4069_v62  ;;  %v2386_v5 = vrot.slane %v2349_v49, 4  ;;  %v2376_v24 = vrot.slane %v2333_v36, 4  ;;  %v2400_v39 = vrot.slane %v2357_v30, 4  ;;  %v3094_v11 = vld [vmem:[%s5080_s5 + $0x50] sm:$0xf]  ;;  %s3614_s16 = sshra.s32 %s2868_s7, 4  ;;  %s3615_s16 = int_to_ptr.hbm [resolvable:$true] %s3614_s16 }
 0x5b9   : > { %v2424_v10 = vrot.slane %v2381_v61, 4  ;;  %v2410_v16 = vrot.slane %v2373_v45, 4  ;;  %v2412_v22 = vrot.slane %v2361_v29, 4  ;;  %v2388_v6 = vrot.slane %v2337_v25, 4  ;;  %p3621_p12 = scmp.lt.s32.totalorder %s3615_s16, %s5084_s9 }
 0x5ba   : > { %v2422_v17 = vrot.slane %v2405_v43, 4  ;;  %v2387_v54 = vsel %vm579_vm5, %v2386_v5, %v2337_v25  ;;  %v2377_v8 = vsel %vm579_vm5, %v2345_v31, %v2376_v24  ;;  %v2401_v46 = vsel %vm579_vm5, %v2369_v20, %v2400_v39  ;;  %2520 = vmatpush.bf16.msrb.mxu0 %v3162_v7  ;;  %v3175_v25 = vld [vmem:[%s5080_s5 + $0x58] sm:$0xf0]  ;;  %v3174_v5 = vld [vmem:[%s5080_s5 + $0x50] sm:$0xf0] }
 0x5bb   : > { %v2425_v58 = vsel %vm579_vm5, %v2405_v43, %v2424_v10  ;;  %v2393_v42 = vperm.slane %v2387_v54, %v4069_v62  ;;  %v2411_v63 = vsel %vm579_vm5, %v2410_v16, %v2361_v29  ;;  %v2385_v15 = vperm.slane %v2377_v8, %v4069_v62  ;;  %v3173_v24 = vld [vmem:[%s5080_s5 + $0x4c] sm:$0xf]  ;;  %v3088_v39 = vld [vmem:[%s5080_s5 + $0x54] sm:$0xf0]  ;;  %v3074_v54 = vld [vmem:[%s5080_s5 + $0x30] sm:$0xf] }
 0x5bc   : > { %2439 = vrot.lane.b32.xlu1 %v2425_v58, %s3699_s17  ;;  %v2417_v34 = vperm.slane %v2411_v63, %v4069_v62  ;;  %v2413_v0 = vsel %vm579_vm5, %v2373_v45, %v2412_v22  ;;  %v2409_v48 = vperm.slane %v2401_v46, %v4069_v62  ;;  %v2423_v2 = vsel %vm579_vm5, %v2422_v17, %v2381_v61  ;;  %v3086_v45 = vld [vmem:[%s5080_s5 + $0x48] sm:$0xf]  ;;  %v3082_v22 = vld [vmem:[%s5080_s5 + $0x38] sm:$0xf]  ;;  %v3172_v17 = vld [vmem:[%s5080_s5 + $0x40] sm:$0xf0] }
 0x5bd   : > { %v2428_v26 = vrot.slane %v2385_v15, 4  ;;  %v2432_v53 = vrot.slane %v2393_v42, 4  ;;  %v2421_v51 = vperm.slane %v2413_v0, %v4069_v62  ;;  %v2389_v27 = vsel %vm579_vm5, %v2349_v49, %v2388_v6  ;;  %v3171_v46 = vld [vmem:[%s5080_s5 + $0x38] sm:$0xf0]  ;;  %v3170_v58 = vld [vmem:[%s5080_s5 + $0x34] sm:$0xf] }
 0x5be   : > { %v2430_v40 = vrot.slane %v2417_v34, 4  ;;  %v2426_v37 = vrot.slane %v2409_v48, 4  ;;  %v2397_v13 = vperm.slane %v2389_v27, %v4069_v62  ;;  %2521 = vmatpush.bf16.msrb.mxu0 %v3161_v14  ;;  %v3160_v62 = vld [vmem:[#allocation5] sm:$0xff]  ;;  %v3095_v43 = vor.u32 %v3175_v25, %v3094_v11  ;;  %v3169_v0 = vld [vmem:[%s5080_s5 + $0x28] sm:$0xf0]  ;;  %v3180_v11 = vld [vmem:[%s5081_s6 + $0x20] sm:$0xff] }
 0x5bf   : > { %v2429_v59 = vsel %vm579_vm5, %v2409_v48, %v2428_v26  ;;  %v2433_v52 = vsel %vm579_vm5, %v2417_v34, %v2432_v53  ;;  %v2434_v12 = vrot.slane %v2421_v51, 4  ;;  %v3087_v10 = vor.u32 %v3174_v5, %v3086_v45  ;;  %v3070_v34 = vld [vmem:[%s5080_s5 + $0x20] sm:$0xf]  ;;  %v3062_v48 = vld [vmem:[%s5080_s5 + $0x18] sm:$0xf]  ;;  %v3185_v25 = vld [vmem:[%s5081_s6 + $0x48] sm:$0xff] }
 0x5c0   : > { %v2431_v33 = vsel %vm579_vm5, %v2430_v40, %v2393_v42  ;;  %2447 = vrot.lane.b32.xlu2 %v2429_v59, %s3700_s8  ;;  %v2427_v4 = vsel %vm579_vm5, %v2426_v37, %v2385_v15  ;;  %v2436_v9 = vrot.slane %v2397_v13, 4  ;;  %v3091_v16 = vor.u32 %v3173_v24, %v3088_v39  ;;  %2665 = vmatpush.bf16.msrb.mxu3 %v3095_v43  ;;  %v3076_v42 = vld [vmem:[%s5080_s5 + $0x3c] sm:$0xf0]  ;;  %v3168_v26 = vld [vmem:[%s5080_s5 + $0x20] sm:$0xf0]  ;;  %v3179_v5 = vld [vmem:[%s5081_s6 + $0x18] sm:$0xff] }
 0x5c1   : > { %2451 = vrot.lane.b32.xlu0 %v2431_v33, %s3684_s3  ;;  %v2435_v21 = vsel %vm579_vm5, %v2434_v12, %v2397_v13  ;;  %s3704_s3 = smov 56   ;;  %v3083_v8 = vor.u32 %v3172_v17, %v3082_v22  ;;  %2639 = vmatpush.bf16.msra.mxu1 %v3087_v10  ;;  %v3075_v63 = vor.u32 %v3171_v46, %v3074_v54  ;;  %v3167_v40 = vld [vmem:[%s5080_s5 + $0x1c] sm:$0xf]  ;;  %v3064_v6 = vld [vmem:[%s5080_s5 + $0x24] sm:$0xf0]  ;;  %v3178_v24 = vld [vmem:[%s5081_s6 + $0x10] sm:$0xff] }
 0x5c2   : > { %v2437_v50 = vsel %vm579_vm5, %v2421_v51, %v2436_v9  ;;  %2522 = vmatpush.bf16.msrb.mxu0 %v3160_v62  ;;  %vm2473_vm5 = vcmask 326656   ;;  %2652 = vmatpush.bf16.msra.mxu2 %v3091_v16  ;;  %v3079_v15 = vor.u32 %v3170_v58, %v3076_v42  ;;  %v3071_v59 = vor.u32 %v3169_v0, %v3070_v34  ;;  %v3058_v27 = vld [vmem:[%s5080_s5 + $0x8] sm:$0xf]  ;;  %v3050_v12 = vld [vmem:[%s5080_s5] sm:$0xf]  ;;  %s2865_s17 = sshll.u32 %s395_s20, 4  ;;  %s2866_s17 = int_to_ptr.vmem [resolvable:$true] %s2865_s17 }
 0x5c3   : > { %v3063_v51 = vor.u32 %v3168_v26, %v3062_v48  ;;  %v3067_v33 = vor.u32 %v3167_v40, %v3064_v6  ;;  %v3164_v37 = vld [vmem:[%s5080_s5 + $0x4] sm:$0xf]  ;;  %v3052_v13 = vld [vmem:[%s5080_s5 + $0xc] sm:$0xf0]  ;;  %v3177_v10 = vld [vmem:[%s5081_s6 + $0x8] sm:$0xff]  ;;  %s2853_s8 = scalar_lea.sflag [#allocation4], %s3862_s25 }
 0x5c4   : > { %2455 = vrot.lane.b32.xlu1 %v2433_v52, %s3701_s22  ;;  %2666 = vmatpush.bf16.msrb.mxu3 %v3083_v8  ;;  %v3166_v52 = vld [vmem:[%s5080_s5 + $0x10] sm:$0xf0]  ;;  %v3184_v54 = vld [vmem:[%s5081_s6 + $0x40] sm:$0xff]  ;;  %s3616_s22 = scalar_lea.hbm %s3615_s16, 8 }
 0x5c5   : > { %2640 = vmatpush.bf16.msra.mxu1 %v3075_v63  ;;  %v3176_v8 = vld [vmem:[%s5081_s6] sm:$0xff]  ;;  %p3617_p1 = scmp.ne.s32.totalorder %s3615_s16, %s3616_s22  ;;  %p3622_p8 = scmp.lt.s32.totalorder %s3620_s24, %s3616_s22 }
 0x5c6   : > { %2653 = vmatpush.bf16.msra.mxu2 %v3079_v15 }
 0x5c7   : > { %p3618_p3 = pnand %p3617_p1, %p3831_p13  ;;  %p3623_p7 = por %p3622_p8, %p3621_p12 }
 0x5c8   : > { %2459 = vrot.lane.b32.xlu2 %v2435_v21, %s3702_s15  ;;  %2667 = vmatpush.bf16.msrb.mxu3 %v3071_v59 }
 0x5c9   : > { %2443 = vrot.lane.b32.xlu0 %v2427_v4, %s3703_s29  ;;  %v3059_v4 = vor.u32 %v3166_v52, %v3058_v27  ;;  %2641 = vmatpush.bf16.msra.mxu1 %v3063_v51  ;;  %p3619_p5 = pneg %p3618_p3 }
 0x5ca   : > { %2654 = vmatpush.bf16.msra.mxu2 %v3067_v33 }
 0x5cb   : > { %p3624_p9 = pnand %p3623_p7, %p3619_p5 }
 0x5cc   : > { %2668 = vmatpush.bf16.msrb.mxu3 %v3059_v4 }
 0x5d1   : > { %2463 = vrot.lane.b32.xlu0 %v2437_v50, %s3704_s3  ;;  %v3055_v50 = vor.u32 %v3164_v37, %v3052_v13 }
 0x5d3   : > { %2655 = vmatpush.bf16.msra.mxu2 %v3055_v50 }
 0x61a   : > { %v2448_v31 = vpop.permute.xlu2 %2447 }
 0x622   : > { %v2460_v60 = vpop.permute.xlu2 %2459 }
 0x62e   : > { %v2440_v3 = vpop.permute.xlu1 %2439 }
 0x62f   : > { %v2466_v56 = vsel %vm1708_vm7, %v2423_v2, %v2440_v3 }
 0x633   : > { %v2452_v23 = vpop.permute.xlu0 %2451 }
 0x636   : > { %v2456_v19 = vpop.permute.xlu1 %2455 }
 0x63b   : > { %v2444_v36 = vpop.permute.xlu0 %2443 }
 0x63c   : > { %v2468_v38 = vsel %vm2467_vm1, %v2466_v56, %v2444_v36 }
 0x63d   : > { %v2470_v18 = vsel %vm2469_vm2, %v2468_v38, %v2448_v31  ;;  %v3432_v31 = vld [vmem:[%s5079_s4] ss:$0 sm:$0xff] }
 0x63e   : > { %v2472_v20 = vsel %vm2471_vm3, %v2470_v18, %v2452_v23 }
 0x63f   : > { %v2474_v57 = vsel %vm2473_vm5, %v2472_v20, %v2456_v19  ;;  %v3183_v20 = vld [vmem:[%s5081_s6 + $0x38] sm:$0xff] }
 0x640   : > { %v2476_v30 = vsel %vm2475_vm4, %v2474_v57, %v2460_v60  ;;  %2824 = vmatpush.bf16.msra.mxu0 %v3183_v20 }
 0x643   : > { %v2464_v47 = vpop.permute.xlu0 %2463 }
 0x644   : > { %v2478_v41 = vsel %vm2477_vm6, %v2476_v30, %v2464_v47 }
 0x645   : > { %v2479_v49 = vpack.c.bf16 %v2478_v41, %v2478_v41 }
 0x647   : > { %3047 = vmatmul.msk.bf16.vlgmr.msrb.gmra.mxu0 %vm399_vm0, %v2479_v49  ;;  %v3182_v49 = vld [vmem:[%s5081_s6 + $0x30] sm:$0xff] }
 0x648   : > { %2825 = vmatpush.bf16.msra.mxu0 %v3182_v49 }
 0x6c4   : > { %v2524_v28 = vpop.f32.mrf.mxu0 }
 0x6c5   : > { %v4904_v1 = vadd.f32 %v3479_v44, %v2524_v28  ;;  %v3187_v28 = vld [vmem:[%s5081_s6 + $0x58] sm:$0xff]  ;;  %v3181_v44 = vld [vmem:[%s5081_s6 + $0x28] sm:$0xff] }
 0x6c6   : > { %2826 = vmatpush.bf16.msra.mxu0 %v3181_v44 }
 0x6c7   : > { %v2529_v29 = vmul.f32 %v4904_v1, %v4904_v1 }
 0x6c9   : > { %v2530_v55 = vsel %vm399_vm0, %v2529_v29, 0.0  ;;  %v3186_v29 = vld [vmem:[%s5081_s6 + $0x50] sm:$0xff] }
 0x6ca   : > { %2531 = vadd.xlane.f32.xlu1 %v2530_v55  ;;  %2827 = vmatpush.bf16.msra.mxu0 %v3180_v11 }
 0x6cc   : > { %v2526_v61 = vpop.f32.mrf.mxu0 }
 0x6ce   : > { %2828 = vmatpush.bf16.msra.mxu0 %v3179_v5 }
 0x6d2   : > { %2829 = vmatpush.bf16.msra.mxu0 %v3178_v24 }
 0x6d6   : > { %2830 = vmatpush.bf16.msra.mxu0 %v3177_v10 }
 0x6da   : > { %2831 = vmatpush.bf16.msra.mxu0 %v3176_v8 }
 0x73d   : > { %v2532_v2 = vpop.xlane.xlu1 %2531 }
 0x73e   : > { %v2533_v53 = vmul.f32 %v2532_v2, %v3944_v35  ;;  %v3165_v35 = vld [vmem:[%s5080_s5 + $0x8] sm:$0xf0] }
 0x73f   : > { %v3051_v9 = vor.u32 %v3165_v35, %v3050_v12 }
 0x740   : > { %v2534_v21 = vadd.f32 1e-05, %v2533_v53 }
 0x741   : > { %2642 = vmatpush.bf16.msra.mxu1 %v3051_v9 }
 0x742   : > { %3469 = vrsqrt.f32 %v2534_v21  ;;  %vm2541_vm8 = vweird.f32 %v2534_v21 }
 0x745   : > { %2841 = vmatpush.bf16.msrb.mxu1 %v3187_v28 }
 0x748   : > { %v3470_v32 = vpop.eup %3469 }
 0x749   : > { %v2536_v7 = vmul.f32 %v3470_v32, %v2534_v21  ;;  %vm2542_vm7 = vweird.f32 %v3470_v32  ;;  %2842 = vmatpush.bf16.msrb.mxu1 %v3186_v29 }
 0x74a   : > { %vm2543_vm9 = vmor %vm2541_vm8, %vm2542_vm7 }
 0x74b   : > { %v2537_v14 = vmul.f32 %v3470_v32, %v2536_v7 }
 0x74d   : > { %v2538_v62 = vmul.f32 0.5, %v2537_v14  ;;  %2843 = vmatpush.bf16.msrb.mxu1 %v3185_v25 }
 0x74f   : > { %v2539_v23 = vsub.f32 1.5, %v2538_v62 }
 0x751   : > { %v2540_v3 = vmul.f32 %v3470_v32, %v2539_v23  ;;  %2844 = vmatpush.bf16.msrb.mxu1 %v3184_v54 }
 0x753   : > { %v2544_v56 = vsel %vm2543_vm9, %v3470_v32, %v2540_v3 }
 0x754   : > { %v2545_v36 = vmul.f32 %v2544_v56, %v4904_v1 }
 0x756   : > { %v2550_v38 = vmul.f32 %v3432_v31, %v2545_v36 }
 0x758   : > { %v2551_v18 = vpack.c.bf16 %v2550_v38, %v2550_v38 }
 0x75a   : > { %3096 = vmatmul.msk.bf16.vlgmr.msra.gmra.mxu1 %vm399_vm0, %v2551_v18  ;;  %3097 = vmatmul.msk.bf16.vlgmr.msra.gmra.mxu2 %vm399_vm0, %v2551_v18 }
 0x75b   : > { %3098 = vmatmul.msk.bf16.vlgmr.msrb.gmra.mxu3 %vm399_vm0, %v2551_v18 }
 0x7d7   : > { %v4992_v19 = vpop.f32.mrf.mxu1 }
 0x7d8   : > { %v2674_v61 = vsub.f32 0.0, %v4992_v19 }
 0x7da   : > { %v2676_v43 = vmul.f32 1.442695, %v2674_v61 }
 0x7dd   : > { %v4994_v57 = vpop.f32.mrf.mxu2 }
 0x7de   : > { %v2670_v60 = vpop.f32.mrf.mxu3  ;;  %2714 = vrot.lane.b32.xlu2 %v4994_v57, %s3683_s13  ;;  %v2675_v55 = vsub.f32 0.0, %v4994_v57 }
 0x7df   : > { %2716 = vrot.lane.b32.xlu0 %v2670_v60, %s3683_s13  ;;  %v2646_v47 = vpop.f32.mrf.mxu1 }
 0x7e0   : > { %v2678_v45 = vmul.f32 1.442695, %v2675_v55 }
 0x7e2   : > { %3471 = vpow2.f32 %v2678_v45 }
 0x7e3   : > { %3473 = vpow2.f32 %v2676_v43 }
 0x7e5   : > { %v2659_v30 = vpop.f32.mrf.mxu2 }
 0x7e6   : > { %v2672_v41 = vpop.f32.mrf.mxu3 }
 0x7e8   : > { %v3472_v39 = vpop.eup %3471 }
 0x7e9   : > { %v3474_v16 = vpop.eup %3473  ;;  %v2681_v22 = vadd.f32 1.0, %v3472_v39 }
 0x7ea   : > { %v2680_v17 = vadd.f32 1.0, %v3474_v16 }
 0x7eb   : > { %3475 = vrcp.f32 %v2681_v22  ;;  %v2707_v6 = vand.u32 2147483648, %v2681_v22  ;;  %vm2701_vm12 = vweird.f32 %v2681_v22  ;;  %v2705_v59 = vand.u32 2147483647, %v2681_v22 }
 0x7ec   : > { %3477 = vrcp.f32 %v2680_v17  ;;  %v2693_v2 = vand.u32 2147483648, %v2680_v17  ;;  %vm2687_vm13 = vweird.f32 %v2680_v17  ;;  %v2691_v53 = vand.u32 2147483647, %v2680_v17 }
 0x7ed   : > { %v2708_v27 = vor.u32 1.1754944e-38, %v2707_v6  ;;  %vm2706_vm1 = vcmp.eq.f32.partialorder %v2705_v59, 8.507059e+37 }
 0x7ee   : > { %v2694_v52 = vor.u32 1.1754944e-38, %v2693_v2  ;;  %vm2692_vm2 = vcmp.eq.f32.partialorder %v2691_v53, 8.507059e+37 }
 0x7f1   : > { %v3476_v46 = vpop.eup %3475 }
 0x7f2   : > { %v3478_v58 = vpop.eup %3477  ;;  %v2697_v42 = vmul.f32 %v3476_v46, %v2681_v22  ;;  %vm2702_vm10 = vweird.f32 %v3476_v46 }
 0x7f3   : > { %v2683_v63 = vmul.f32 %v3478_v58, %v2680_v17  ;;  %vm2688_vm11 = vweird.f32 %v3478_v58  ;;  %vm2703_vm14 = vmor %vm2701_vm12, %vm2702_vm10 }
 0x7f4   : > { %v2698_v15 = vsub.f32 1.0, %v2697_v42  ;;  %vm2689_vm15 = vmor %vm2687_vm13, %vm2688_vm11 }
 0x7f5   : > { %v2684_v34 = vsub.f32 1.0, %v2683_v63 }
 0x7f6   : > { %v2699_v0 = vmul.f32 %v3476_v46, %v2698_v15 }
 0x7f7   : > { %v2685_v48 = vmul.f32 %v3478_v58, %v2684_v34 }
 0x7f8   : > { %v2700_v26 = vadd.f32 %v3476_v46, %v2699_v0 }
 0x7f9   : > { %v2686_v40 = vadd.f32 %v3478_v58, %v2685_v48 }
 0x7fa   : > { %v2704_v51 = vsel %vm2703_vm14, %v3476_v46, %v2700_v26 }
 0x7fb   : > { %v2690_v33 = vsel %vm2689_vm15, %v3478_v58, %v2686_v40  ;;  %v2709_v12 = vsel %vm2706_vm1, %v2708_v27, %v2704_v51 }
 0x7fc   : > { %v2695_v35 = vsel %vm2692_vm2, %v2694_v52, %v2690_v33  ;;  %v2711_v37 = vmul.f32 %v2709_v12, %v4994_v57 }
 0x7fd   : > { %v2710_v13 = vmul.f32 %v2695_v35, %v4992_v19 }
 0x838   : > { %v2715_v21 = vpop.permute.xlu2 %2714 }
 0x851   : > { %v2717_v4 = vpop.permute.xlu0 %2716 }
 0x852   : > { %v2718_v9 = vsel %vm399_vm0, %v2715_v21, %v2717_v4  ;;  %v2722_v50 = vmul.f32 %v2717_v4, %v2711_v37 }
 0x853   : > { %v2721_v32 = vmul.f32 %v2718_v9, %v2710_v13 }
 0x854   : > { %v2724_v7 = vpack.c.bf16 %v2722_v50, %v2722_v50 }
 0x855   : > { %v2723_v14 = vpack.c.bf16 %v2721_v32, %v2721_v32 }
 0x856   : > { %3147 = vmatmul.msk.bf16.vlgmr.msrb.gmra.mxu1 %vm399_vm0, %v2724_v7 }
 0x857   : > { %2832 = vmatmul.bf16.vlgmr.msra.gmra.mxu0 %v2723_v14 }
 0x8d3   : > { %v2846_v62 = vpop.f32.mrf.mxu1 }
 0x8d4   : > { %v2833_v23 = vpop.f32.mrf.mxu0 }
 0x8d5   : > { %v2847_v3 = vadd.f32 %v2846_v62, %v2833_v23 }
 0x8d7   : > { %v2850_v31 = vadd.f32 %v2847_v3, %v4904_v1 }
 0x8d9   : > { %2851 = vst.msk [vmem:[%s395_s20] sm:$0xff] %vm399_vm0, %v2850_v31 }
 0x8da   : > { %3627 = shalt.err (!%p3624_p9)
}
 0x8db   : > { %3202 = dma.vmem_to_hbm [thread:$0]  (%p3831_p13), %s2866_s17, 128, %s2868_s7, %s2853_s8   ;;  %v2848_v1 = vpop.f32.mrf.mxu1 }
 0x8dc   : > { %v2835_v56 = vpop.f32.mrf.mxu0 }
 0x8dd PF: > { %s2879_s25 = sand.u32 1, %s3662_s30   ;;  %p5107_p10 = scmp.ge.s32.totalorder %s3674_s12, 2 }
 0x8de   : > { %s2880_s27 = scalar_lea.sflag [#allocation4], %s2879_s25 }
 0x8df   : > { %p3219_p11 = pnand %p5107_p10, %p3836_p4 }
 0x8e1   : > { %p3220_p0 = pneg %p3219_p11 }
 0x8e3   : > { %3657 = dma.done.wait (%p3220_p0), %s2880_s27, 128  }
 0x8e4   : > { %3659 = vsyncadd (%p3220_p0), %s2880_s27, 4294967168  ;;  %p24_p13 = scmp.ge.s32.totalorder %s3811_s21, 4   ;;  %s5108_s30 = smov %s3666_s10 }
 0x8e5   : > { %s5109_s10 = smov %s3670_s11  ;;  %s5110_s11 = smov %s3823_s19 }
 0x8e6   : > { %s5111_s12 = smov %s3811_s21  ;;  %26 = sbr.rel (!%p24_p13) target bundleno = 11 (0xb), region = 113 }
 0x8eb   :  { %2886 = vsyncpa [#allocation3], 1 }
 0x8ec   :  { %2888 = vsyncpa [#allocation3 + $0x1], 1 }
 0x8ed   :  { %2889 = vsyncpa [#allocation6], 1 }
 0x8ee   :  { %2890 = vsyncpa [#allocation9], 1 }
 0x8ef   :  { %2891 = vsyncpa [#allocation4], 1 }
 0x8f0   :  { %2893 = vsyncpa [#allocation4 + $0x1], 1 }

</bundles_post_ra>
